<compile_context>
chip_gen: v5e
topology: v5e:2x2
jax: 0.10.0
libtpu: 0.0.40
codegen_flags: <defaults>
</compile_context>

<pallas_src>
import functools
import math

import numpy as np

import jax
import jax.numpy as jnp
from jax.experimental import pallas as pl
from jax.experimental.pallas import tpu as pltpu


def _round_up(x: int, m: int) -> int:
    return (x + m - 1) // m * m


def _conv3x3_kernel(x_ref, w_ref, b_ref, o_ref, *, wpad: int, fold_kw: bool):
    """3x3 / stride-1 conv over a flattened, zero-padded NHWC slab.

    x_ref: (n, C)      bf16  n = nb*Hp*Wpad flattened slab rows
    w_ref: (3, 3C, C)  bf16  w_ref[kh, kw*C + ci, co]
    b_ref: (1, C)      f32
    o_ref: (m, C)      bf16  m = n - 2*Wpad

    out[r] = b + sum_kh concat(x[r+kh*Wpad], x[r+kh*Wpad+1], x[r+kh*Wpad+2]) @ w[kh]

    LOAD-BEARING LAYOUT INVARIANT: the roll wrap-around rows (last 1-2 slab
    rows of x1/x2) and the kh*Wpad result shifts are only ever consumed by
    don't-care output rows (h >= Hn or w >= Wn padding lanes), because
    Hp = Hn + 2 and Wpad >= Wn + 2.  Do not change the layout without
    re-checking this.
    """
    n, c = x_ref.shape
    m = o_ref.shape[0]
    assert m == n - 2 * wpad  # static shapes

    x0 = x_ref[...]                                            # (n, C) bf16
    # kw-shifted copies: XLU sublane rotate in f32 (packed bf16 sublane rolls
    # don't lower cleanly everywhere), cast straight back to bf16 so no
    # (n, 3C) f32 temp is ever materialized.
    x0f = x0.astype(jnp.float32)
    x1 = pltpu.roll(x0f, n - 1, axis=0).astype(jnp.bfloat16)   # x1[r] = x0[r+1]
    x2 = pltpu.roll(x0f, n - 2, axis=0).astype(jnp.bfloat16)   # x2[r] = x0[r+2]

    if fold_kw:
        # K = 3C: one MXU matmul per kh tap (75% depth utilisation of the
        # 256-deep v6e/v7x MXUs at C=128 vs 50% for K=C).
        xc = jnp.concatenate([x0, x1, x2], axis=-1)            # (n, 3C) bf16
        y = [jnp.dot(xc, w_ref[kh], preferred_element_type=jnp.float32)
             for kh in range(3)]
    else:
        # 128-deep MXU (v2-v5): K = C already fills the contraction depth;
        # skip the lane concat and issue 9 K=C matmuls.
        xs = (x0, x1, x2)
        y = []
        for kh in range(3):
            t = jnp.dot(xs[0], w_ref[kh, 0:c, :],
                        preferred_element_type=jnp.float32)
            for kw in range(1, 3):
                t = t + jnp.dot(xs[kw], w_ref[kh, kw * c:(kw + 1) * c, :],
                                preferred_element_type=jnp.float32)
            y.append(t)

    # kh taps become 8-aligned f32 row shifts of the matmul results.
    # Accumulate in a value and store the output block exactly once, in bf16.
    acc = (b_ref[...] + y[0][0:m, :] + y[1][wpad:wpad + m, :]
           + y[2][2 * wpad:2 * wpad + m, :])
    o_ref[...] = acc.astype(o_ref.dtype)


def _weight_block_spec(c: int, single_buffer: bool) -> pl.BlockSpec:
    index_map = lambda g: (0, 0, 0)
    if single_buffer:
        try:
            # Constant block index -> fetched once; the default second buffer
            # (18*C^2 bytes) is pure waste, so single-buffer it.
            return pl.BlockSpec((3, 3 * c, c), index_map,
                                pipeline_mode=pl.Buffered(1))
        except Exception:  # older jax without pipeline_mode / Buffered
            pass
    return pl.BlockSpec((3, 3 * c, c), index_map)


def conv3x3_flat(x_flat, w, bias2d, *, n_per_g: int, m_per_g: int, wpad: int,
                 fold_kw: bool, vmem_limit: int, single_buffer_w: bool):
    """Runs the conv kernel over G = N // n_per_g groups of slab rows.

    x_flat : (G*n_per_g, C) bf16   pre-flattened zero-padded NHWC slabs
    w      : (3, 3C, C)     bf16   bias2d: (1, C) f32
    Returns (G*m_per_g, C) bf16; the conv output of image g*nb + n at pixel
    (h, w) sits at row g*m_per_g + (n*Hp + h)*Wpad + w.
    """
    n_total, c = x_flat.shape
    g_steps = n_total // n_per_g
    kernel = functools.partial(_conv3x3_kernel, wpad=wpad, fold_kw=fold_kw)
    return pl.pallas_call(
        kernel,
        out_shape=jax.ShapeDtypeStruct((g_steps * m_per_g, c), jnp.bfloat16),
        grid_spec=pltpu.PrefetchScalarGridSpec(
            num_scalar_prefetch=0,
            grid=(g_steps,),
            in_specs=[
                pl.BlockSpec((n_per_g, c), lambda g: (g, 0)),
                _weight_block_spec(c, single_buffer_w),
                pl.BlockSpec((1, c), lambda g: (0, 0)),
            ],
            out_specs=pl.BlockSpec((m_per_g, c), lambda g: (g, 0)),
        ),
        compiler_params=pltpu.CompilerParams(
            dimension_semantics=("parallel",),
            vmem_limit_bytes=int(vmem_limit),
        ),
    )(x_flat, w, bias2d)


class Expert:
    """JAX/Pallas port of the PyTorch Expert module (NCHW in / NCHW out)."""

    def __init__(self, embedding_dim: int, scale: float, key,
                 safe_mode: bool = False) -> None:
        assert embedding_dim % 128 == 0, "kernel assumes lane-aligned channels"
        self.scale = scale
        self.dim = embedding_dim
        k1, k2 = jax.random.split(key)
        fan_in = embedding_dim * 3 * 3
        bound = 1.0 / math.sqrt(fan_in)
        # PyTorch Conv2d default init; weight layout (Cout, Cin, kh, kw).
        self.w_oihw = jax.random.uniform(
            k1, (embedding_dim, embedding_dim, 3, 3), jnp.float32, -bound, bound)
        self.bias = jax.random.uniform(
            k2, (embedding_dim,), jnp.float32, -bound, bound)
        # Kernel layout: (kh, kw*Cin, Cout) bf16 -> each kh tap is one (3C, C)
        # MXU operand matching the lane-concatenated kw-shifted activations.
        w_khkwio = jnp.transpose(self.w_oihw, (2, 3, 1, 0))       # (3,3,Ci,Co)
        self.w = w_khkwio.reshape(
            3, 3 * embedding_dim, embedding_dim).astype(jnp.bfloat16)
        self.bias2d = self.bias.reshape(1, embedding_dim)

        # ---- hardware-derived knobs -------------------------------------
        kind = ""
        try:
            kind = jax.devices()[0].device_kind.lower()
        except Exception:
            pass
        vmem_cap = 0
        if not safe_mode:
            try:
                vmem_cap = int(pltpu.get_tpu_info().vmem_capacity_bytes)
            except Exception:
                vmem_cap = 0
        if vmem_cap <= 0:
            small_vmem = ("v7" in kind) or ("tpu7" in kind)
            vmem_cap = (64 if small_vmem else 128) * 1024 * 1024
        self._vmem_limit = (32 * 1024 * 1024 if safe_mode
                            else max(32 * 1024 * 1024, int(vmem_cap * 0.75)))
        # 128-deep-MXU generations (v2-v5): skip the K=3C lane concat.
        older_mxu = any(t in kind for t in ("v2", "v3", "v4", "v5"))
        self._fold_kw = True if safe_mode else (not older_mxu)
        self._single_buffer_w = not safe_mode
        self._fwd = jax.jit(self._forward)

    def __call__(self, x_nchw):
        return self._fwd(x_nchw)

    def _forward(self, x_nchw):
        B, C, H, W = x_nchw.shape
        assert C == self.dim
        Hn, Wn = int(H * self.scale), int(W * self.scale)
        Hp = Hn + 2                      # one zero row above / below
        Wpad = _round_up(Wn + 2, 8)      # zero col left + >=1 right, 8-aligned
        # TODO(synk): pack multiple image rows per 8-sublane group (or pick
        # resize targets with Wn+2 near a multiple of 8) to cut Wpad waste.

        # ---- group size / grid (static, hardware-derived) -----------------
        rows_per_img = Hp * Wpad
        bytes_per_img = 40 * rows_per_img * C           # bf16 blocks + f32 temps
        weight_bytes = 2 * 9 * C * C * 2                # bf16 weights, 2 buffers
        usable = max(bytes_per_img,
                     int(self._vmem_limit * 0.8) - weight_bytes)
        nb = int(min(max(1, usable // bytes_per_img),              # VMEM cap
                     max(1, -(-2048 // rows_per_img)),             # M ~ 2K rows
                     max(1, B)))
        if B >= 2:
            # keep >= 2 grid steps so the pipeline overlaps and both v7x
            # TensorCores get work.
            nb = min(nb, -(-B // 2))
        nb = max(1, nb)
        G = -(-B // nb)
        nb = -(-B // G)                  # balance groups -> minimal batch pad
        if (Wpad % 16) and (Hp % 2) and (nb % 2):
            nb += 1                      # keep bf16 block rows 16-aligned
        G = -(-B // nb)
        B_pad = G * nb
        M = (nb * Hp - 2) * Wpad         # output rows per grid step
        # TODO(synk): halo'd H-tiling so a single image block can't outgrow
        # VMEM (v7x 64 MiB) for very large Hn*Wn*C.

        # ---- prep glue: one masked gather = resize + zero-pad -------------
        # TODO(synk): fuse the resize/pad (and this transpose) into the
        # pallas_call via scalar-prefetched row-index maps to drop the extra
        # HBM round trips.
        hi = np.clip(np.floor(np.arange(Hn) * (H / Hn)).astype(np.int64),
                     0, H - 1).astype(np.int32)
        wi = np.clip(np.floor(np.arange(Wn) * (W / Wn)).astype(np.int64),
                     0, W - 1).astype(np.int32)
        hsrc = np.zeros(Hp, np.int32); hsrc[1:Hn + 1] = hi
        wsrc = np.zeros(Wpad, np.int32); wsrc[1:Wn + 1] = wi
        mask = np.zeros((Hp, Wpad), bool)
        mask[1:Hn + 1, 1:Wn + 1] = True
        gathered = x_nchw[:, :, hsrc[:, None], wsrc[None, :]]    # (B,C,Hp,Wpad)
        xp = jnp.where(mask[None, None], gathered, 0.0).astype(jnp.bfloat16)
        xp = jnp.transpose(xp, (0, 2, 3, 1))                     # (B,Hp,Wpad,C)
        if B_pad > B:
            xp = jnp.pad(xp, ((0, B_pad - B), (0, 0), (0, 0), (0, 0)))
        x_flat = xp.reshape(B_pad * rows_per_img, C)             # (N, C) bf16

        y2d = conv3x3_flat(
            x_flat, self.w, self.bias2d,
            n_per_g=nb * rows_per_img, m_per_g=M, wpad=Wpad,
            fold_kw=self._fold_kw, vmem_limit=self._vmem_limit,
            single_buffer_w=self._single_buffer_w)               # (G*M, C) bf16

        # ---- output glue: one bf16 gather = crop + nearest upsample -------
        # TODO(synk): if the caller can consume NHWC / bf16, drop the final
        # transpose + f32 cast to save one more HBM round trip.
        hi_u = np.clip(np.floor(np.arange(H) * (Hn / H)).astype(np.int64),
                       0, Hn - 1).astype(np.int32)
        wi_u = np.clip(np.floor(np.arange(W) * (Wn / W)).astype(np.int64),
                       0, Wn - 1).astype(np.int32)
        b_idx = np.arange(B, dtype=np.int32)
        gidx, nbi = b_idx // nb, b_idx % nb
        rows = (gidx[:, None, None] * M
                + (nbi[:, None, None] * Hp + hi_u[None, :, None]) * Wpad
                + wi_u[None, None, :]).astype(np.int32)          # (B,H,W)
        y_nhwc = y2d[rows]                                       # (B,H,W,C) bf16
        return jnp.transpose(y_nhwc, (0, 3, 1, 2)).astype(x_nchw.dtype)


def _reference(x_nchw, expert):
    """Pure-JAX f32 reference (lax.conv) for correctness checking."""
    B, C, H, W = x_nchw.shape
    Hn, Wn = int(H * expert.scale), int(W * expert.scale)
    hi = np.floor(np.arange(Hn) * (H / Hn)).astype(np.int32)
    wi = np.floor(np.arange(Wn) * (W / Wn)).astype(np.int32)
    x = x_nchw[:, :, hi][:, :, :, wi]
    y = jax.lax.conv_general_dilated(
        x, expert.w_oihw, window_strides=(1, 1), padding=((1, 1), (1, 1)),
        dimension_numbers=("NCHW", "OIHW", "NCHW"))
    y = y + expert.bias[None, :, None, None]
    hi_u = np.floor(np.arange(H) * (Hn / H)).astype(np.int32)
    wi_u = np.floor(np.arange(W) * (Wn / W)).astype(np.int32)
    return y[:, :, hi_u][:, :, :, wi_u]


if __name__ == "__main__":
    key = jax.random.PRNGKey(0)
    kx, kp = jax.random.split(key)
    B, C, H, W = 2, 128, 16, 16   # embedding_dim=128 keeps channels lane-aligned
    scale = 0.5
    x = jax.random.normal(kx, (B, C, H, W), jnp.float32)

    try:
        expert = Expert(C, scale, kp)
        out = jax.block_until_ready(expert(x))
    except Exception:
        # Portability fallback: conservative settings (no weight
        # single-buffering, default vmem limit, proven K=3C path).
        expert = Expert(C, scale, kp, safe_mode=True)
        out = jax.block_until_ready(expert(x))

    assert out.shape == (B, C, H, W)
    ref = _reference(x, expert)
    err = float(jnp.max(jnp.abs(out - ref)))
    # bf16 matmul operands + bf16 conv output -> relaxed tolerance.
    assert jnp.allclose(out, ref, atol=4e-2, rtol=4e-2), f"max abs err = {err}"
    print("KERNEL_OK")
</pallas_src>

<mosaic_0001>
module attributes {stable_mosaic.version = 11 : i64} {
  func.func @_conv3x3_kernel(%arg0: i32, %arg1: memref<160x128xbf16, #tpu.memory_space<vmem>>, %arg2: memref<3x384x128xbf16, #tpu.memory_space<vmem>>, %arg3: memref<1x128xf32, #tpu.memory_space<vmem>>, %arg4: memref<128x128xbf16, #tpu.memory_space<vmem>>) attributes {dimension_semantics = [#tpu.dimension_semantics<parallel>], iteration_bounds = array<i64: 2>, scalar_prefetch = 0 : i64, scratch_operands = 0 : i64, tpu.core_type = #tpu.core_type<tc>, window_params = [{transform_indices = @transform_0, window_bounds = array<i64: 160, 128>}, {pipeline_mode = #tpu.pipeline_mode<synchronous>, transform_indices = @transform_1, window_bounds = array<i64: 3, 384, 128>}, {pipeline_mode = #tpu.pipeline_mode<synchronous>, transform_indices = @transform_2, window_bounds = array<i64: 1, 128>}, {transform_indices = @transform_3, window_bounds = array<i64: 128, 128>}]} {
    %c0 = arith.constant 0 : index
    %c0_0 = arith.constant 0 : index
    %0 = vector.load %arg1[%c0, %c0_0] : memref<160x128xbf16, #tpu.memory_space<vmem>>, vector<160x128xbf16>
    %1 = arith.extf %0 : vector<160x128xbf16> to vector<160x128xf32>
    %c159_i32 = arith.constant 159 : i32
    %2 = tpu.dynamic_rotate %1 by %c159_i32 dim 0 : vector<160x128xf32>, i32 -> vector<160x128xf32>
    %3 = arith.truncf %2 : vector<160x128xf32> to vector<160x128xbf16>
    %c158_i32 = arith.constant 158 : i32
    %4 = tpu.dynamic_rotate %1 by %c158_i32 dim 0 : vector<160x128xf32>, i32 -> vector<160x128xf32>
    %5 = arith.truncf %4 : vector<160x128xf32> to vector<160x128xbf16>
    %6 = tpu.concatenate %0, %3, %5 in 1 : vector<160x128xbf16>, vector<160x128xbf16>, vector<160x128xbf16> -> vector<160x384xbf16>
    %c0_1 = arith.constant 0 : index
    %c0_2 = arith.constant 0 : index
    %c0_3 = arith.constant 0 : index
    %7 = vector.load %arg2[%c0_1, %c0_2, %c0_3] : memref<3x384x128xbf16, #tpu.memory_space<vmem>>, vector<1x384x128xbf16>
    %8 = vector.shape_cast %7 : vector<1x384x128xbf16> to vector<384x128xbf16>
    %cst = arith.constant dense<0.000000e+00> : vector<160x128xf32>
    %9 = tpu.matmul %6, %8, %cst {dimension_numbers = #tpu.dot_dimension_numbers<[1], [0], [0], [1], [0, 0, 1, 1], [], []>} : vector<160x384xbf16>, vector<384x128xbf16>, vector<160x128xf32> -> vector<160x128xf32>
    %c1 = arith.constant 1 : index
    %c0_4 = arith.constant 0 : index
    %c0_5 = arith.constant 0 : index
    %10 = vector.load %arg2[%c1, %c0_4, %c0_5] : memref<3x384x128xbf16, #tpu.memory_space<vmem>>, vector<1x384x128xbf16>
    %11 = vector.shape_cast %10 : vector<1x384x128xbf16> to vector<384x128xbf16>
    %cst_6 = arith.constant dense<0.000000e+00> : vector<160x128xf32>
    %12 = tpu.matmul %6, %11, %cst_6 {dimension_numbers = #tpu.dot_dimension_numbers<[1], [0], [0], [1], [0, 0, 1, 1], [], []>} : vector<160x384xbf16>, vector<384x128xbf16>, vector<160x128xf32> -> vector<160x128xf32>
    %c2 = arith.constant 2 : index
    %c0_7 = arith.constant 0 : index
    %c0_8 = arith.constant 0 : index
    %13 = vector.load %arg2[%c2, %c0_7, %c0_8] : memref<3x384x128xbf16, #tpu.memory_space<vmem>>, vector<1x384x128xbf16>
    %14 = vector.shape_cast %13 : vector<1x384x128xbf16> to vector<384x128xbf16>
    %cst_9 = arith.constant dense<0.000000e+00> : vector<160x128xf32>
    %15 = tpu.matmul %6, %14, %cst_9 {dimension_numbers = #tpu.dot_dimension_numbers<[1], [0], [0], [1], [0, 0, 1, 1], [], []>} : vector<160x384xbf16>, vector<384x128xbf16>, vector<160x128xf32> -> vector<160x128xf32>
    %c0_10 = arith.constant 0 : index
    %c0_11 = arith.constant 0 : index
    %16 = vector.load %arg3[%c0_10, %c0_11] : memref<1x128xf32, #tpu.memory_space<vmem>>, vector<1x128xf32>
    %17 = vector.extract_strided_slice %9 {offsets = [0, 0], sizes = [128, 128], strides = [1, 1]} : vector<160x128xf32> to vector<128x128xf32>
    %18 = vector.broadcast %16 : vector<1x128xf32> to vector<128x128xf32>
    %19 = arith.addf %18, %17 : vector<128x128xf32>
    %20 = vector.extract_strided_slice %12 {offsets = [16, 0], sizes = [128, 128], strides = [1, 1]} : vector<160x128xf32> to vector<128x128xf32>
    %21 = arith.addf %19, %20 : vector<128x128xf32>
    %22 = vector.extract_strided_slice %15 {offsets = [32, 0], sizes = [128, 128], strides = [1, 1]} : vector<160x128xf32> to vector<128x128xf32>
    %23 = arith.addf %21, %22 : vector<128x128xf32>
    %24 = arith.truncf %23 : vector<128x128xf32> to vector<128x128xbf16>
    %c0_12 = arith.constant 0 : index
    %c0_13 = arith.constant 0 : index
    %25 = vector.load %arg4[%c0_12, %c0_13] : memref<128x128xbf16, #tpu.memory_space<vmem>>, vector<128x128xbf16>
    tpu.vector_store %arg4[%c0_12, %c0_13], %24 {strides = array<i32>} : memref<128x128xbf16, #tpu.memory_space<vmem>>, vector<128x128xbf16>,
    return
  }
  func.func @transform_0(%arg0: i32) -> (i32, i32) {
    %c0_i32 = arith.constant 0 : i32
    %c0_i32_0 = arith.constant 0 : i32
    return %arg0, %c0_i32 : i32, i32
  }
  func.func @transform_1(%arg0: i32) -> (i32, i32, i32) {
    %c0_i32 = arith.constant 0 : i32
    %c0_i32_0 = arith.constant 0 : i32
    %c0_i32_1 = arith.constant 0 : i32
    %c0_i32_2 = arith.constant 0 : i32
    return %c0_i32, %c0_i32_0, %c0_i32_1 : i32, i32, i32
  }
  func.func @transform_2(%arg0: i32) -> (i32, i32) {
    %c0_i32 = arith.constant 0 : i32
    %c0_i32_0 = arith.constant 0 : i32
    %c0_i32_1 = arith.constant 0 : i32
    return %c0_i32, %c0_i32_0 : i32, i32
  }
  func.func @transform_3(%arg0: i32) -> (i32, i32) {
    %c0_i32 = arith.constant 0 : i32
    %c0_i32_0 = arith.constant 0 : i32
    return %arg0, %c0_i32 : i32, i32
  }
}

module attributes {stable_mosaic.version = 11 : i64} {
  func.func @_conv3x3_kernel(%arg0: i32, %arg1: memref<160x128xbf16, #tpu.memory_space<vmem>>, %arg2: memref<3x384x128xbf16, #tpu.memory_space<vmem>>, %arg3: memref<1x128xf32, #tpu.memory_space<vmem>>, %arg4: memref<128x128xbf16, #tpu.memory_space<vmem>>) attributes {dimension_semantics = [#tpu.dimension_semantics<parallel>], iteration_bounds = array<i64: 2>, scalar_prefetch = 0 : i64, scratch_operands = 0 : i64, tpu.core_type = #tpu.core_type<tc>, window_params = [{transform_indices = @transform_0, window_bounds = array<i64: 160, 128>}, {pipeline_mode = #tpu.pipeline_mode<synchronous>, transform_indices = @transform_1, window_bounds = array<i64: 3, 384, 128>}, {pipeline_mode = #tpu.pipeline_mode<synchronous>, transform_indices = @transform_2, window_bounds = array<i64: 1, 128>}, {transform_indices = @transform_3, window_bounds = array<i64: 128, 128>}]} {
    %c0 = arith.constant 0 : index
    %c0_0 = arith.constant 0 : index
    %0 = vector.load %arg1[%c0, %c0_0] : memref<160x128xbf16, #tpu.memory_space<vmem>>, vector<160x128xbf16>
    %1 = arith.extf %0 : vector<160x128xbf16> to vector<160x128xf32>
    %c159_i32 = arith.constant 159 : i32
    %2 = tpu.dynamic_rotate %1 by %c159_i32 dim 0 : vector<160x128xf32>, i32 -> vector<160x128xf32>
    %3 = arith.truncf %2 : vector<160x128xf32> to vector<160x128xbf16>
    %c158_i32 = arith.constant 158 : i32
    %4 = tpu.dynamic_rotate %1 by %c158_i32 dim 0 : vector<160x128xf32>, i32 -> vector<160x128xf32>
    %5 = arith.truncf %4 : vector<160x128xf32> to vector<160x128xbf16>
    %6 = tpu.concatenate %0, %3, %5 in 1 : vector<160x128xbf16>, vector<160x128xbf16>, vector<160x128xbf16> -> vector<160x384xbf16>
    %c0_1 = arith.constant 0 : index
    %c0_2 = arith.constant 0 : index
    %c0_3 = arith.constant 0 : index
    %7 = vector.load %arg2[%c0_1, %c0_2, %c0_3] : memref<3x384x128xbf16, #tpu.memory_space<vmem>>, vector<1x384x128xbf16>
    %8 = vector.shape_cast %7 : vector<1x384x128xbf16> to vector<384x128xbf16>
    %cst = arith.constant dense<0.000000e+00> : vector<160x128xf32>
    %9 = tpu.matmul %6, %8, %cst {dimension_numbers = #tpu.dot_dimension_numbers<[1], [0], [0], [1], [0, 0, 1, 1], [], []>} : vector<160x384xbf16>, vector<384x128xbf16>, vector<160x128xf32> -> vector<160x128xf32>
    %c1 = arith.constant 1 : index
    %c0_4 = arith.constant 0 : index
    %c0_5 = arith.constant 0 : index
    %10 = vector.load %arg2[%c1, %c0_4, %c0_5] : memref<3x384x128xbf16, #tpu.memory_space<vmem>>, vector<1x384x128xbf16>
    %11 = vector.shape_cast %10 : vector<1x384x128xbf16> to vector<384x128xbf16>
    %cst_6 = arith.constant dense<0.000000e+00> : vector<160x128xf32>
    %12 = tpu.matmul %6, %11, %cst_6 {dimension_numbers = #tpu.dot_dimension_numbers<[1], [0], [0], [1], [0, 0, 1, 1], [], []>} : vector<160x384xbf16>, vector<384x128xbf16>, vector<160x128xf32> -> vector<160x128xf32>
    %c2 = arith.constant 2 : index
    %c0_7 = arith.constant 0 : index
    %c0_8 = arith.constant 0 : index
    %13 = vector.load %arg2[%c2, %c0_7, %c0_8] : memref<3x384x128xbf16, #tpu.memory_space<vmem>>, vector<1x384x128xbf16>
    %14 = vector.shape_cast %13 : vector<1x384x128xbf16> to vector<384x128xbf16>
    %cst_9 = arith.constant dense<0.000000e+00> : vector<160x128xf32>
    %15 = tpu.matmul %6, %14, %cst_9 {dimension_numbers = #tpu.dot_dimension_numbers<[1], [0], [0], [1], [0, 0, 1, 1], [], []>} : vector<160x384xbf16>, vector<384x128xbf16>, vector<160x128xf32> -> vector<160x128xf32>
    %c0_10 = arith.constant 0 : index
    %c0_11 = arith.constant 0 : index
    %16 = vector.load %arg3[%c0_10, %c0_11] : memref<1x128xf32, #tpu.memory_space<vmem>>, vector<1x128xf32>
    %17 = vector.extract_strided_slice %9 {offsets = [0, 0], sizes = [128, 128], strides = [1, 1]} : vector<160x128xf32> to vector<128x128xf32>
    %18 = vector.broadcast %16 : vector<1x128xf32> to vector<128x128xf32>
    %19 = arith.addf %18, %17 : vector<128x128xf32>
    %20 = vector.extract_strided_slice %12 {offsets = [16, 0], sizes = [128, 128], strides = [1, 1]} : vector<160x128xf32> to vector<128x128xf32>
    %21 = arith.addf %19, %20 : vector<128x128xf32>
    %22 = vector.extract_strided_slice %15 {offsets = [32, 0], sizes = [128, 128], strides = [1, 1]} : vector<160x128xf32> to vector<128x128xf32>
    %23 = arith.addf %21, %22 : vector<128x128xf32>
    %24 = arith.truncf %23 : vector<128x128xf32> to vector<128x128xbf16>
    %c0_12 = arith.constant 0 : index
    %c0_13 = arith.constant 0 : index
    %25 = vector.load %arg4[%c0_12, %c0_13] : memref<128x128xbf16, #tpu.memory_space<vmem>>, vector<128x128xbf16>
    tpu.vector_store %arg4[%c0_12, %c0_13], %24 {strides = array<i32>} : memref<128x128xbf16, #tpu.memory_space<vmem>>, vector<128x128xbf16>,
    return
  }
  func.func @transform_0(%arg0: i32) -> (i32, i32) {
    %c0_i32 = arith.constant 0 : i32
    %c0_i32_0 = arith.constant 0 : i32
    return %arg0, %c0_i32 : i32, i32
  }
  func.func @transform_1(%arg0: i32) -> (i32, i32, i32) {
    %c0_i32 = arith.constant 0 : i32
    %c0_i32_0 = arith.constant 0 : i32
    %c0_i32_1 = arith.constant 0 : i32
    %c0_i32_2 = arith.constant 0 : i32
    return %c0_i32, %c0_i32_0, %c0_i32_1 : i32, i32, i32
  }
  func.func @transform_2(%arg0: i32) -> (i32, i32) {
    %c0_i32 = arith.constant 0 : i32
    %c0_i32_0 = arith.constant 0 : i32
    %c0_i32_1 = arith.constant 0 : i32
    return %c0_i32, %c0_i32_0 : i32, i32
  }
  func.func @transform_3(%arg0: i32) -> (i32, i32) {
    %c0_i32 = arith.constant 0 : i32
    %c0_i32_0 = arith.constant 0 : i32
    return %arg0, %c0_i32 : i32, i32
  }
}

</mosaic_0001>

<bundles_post_ra>
// kernel: _forward.1
= control target key start
LH: loop header
LB: loop body
LE: loop exit
PB: predicated region body
PF: predicated region fallthrough
CT: control target
= control target key end

     0   :  { %s2359_s12 = smov 0   ;;  %s3091_s0 = inlined_call_operand.vmem [shape: bf16[320,128], index: 0, kind: input, shape index: {}]   ;;  %s3092_s1 = inlined_call_operand.vmem [shape: bf16[3,384,128], index: 1, kind: input, shape index: {}]   ;;  %s3093_s2 = inlined_call_operand.vmem [shape: f32[1,128], index: 2, kind: input, shape index: {}]   ;;  %s3094_s3 = inlined_call_operand.vmem [shape: bf16[256,128], index: 3, kind: output, shape index: {}]  }
   0x1 LB: > { %s1731_s13 = sadd.s32 4294967295, %s2337_s12   ;;  %p1735_p0 = scmp.ge.s32.totalorder %s2337_s12, 1  ;;  %s2337_s12 = sphi %s2359_s12, %s13_s12  }
   0x2   : > { %p138_p1 = scmp.lt.s32.totalorder %s2337_s12, 3 }
   0x4   : > { %p139_p2 = pnand %p1735_p0, %p138_p1 }
   0x6   : > { %142 = sbr.rel (%p139_p2) target bundleno = 536 (0x218), region = 32 }
   0xb   : > { %v2182_v0 = vld [vmem:[%s3092_s1 + $0x38] sm:$0xff]  ;;  %v2181_v1 = vld [vmem:[%s3092_s1 + $0x30] sm:$0xff]  ;;  %v2180_v2 = vld [vmem:[%s3092_s1 + $0x28] sm:$0xff]  ;;  %s162_s22 = smul.u32 20, %s1731_s13  ;;  %v234_v28 = vlaneseq }
   0xc   : > { %710 = vmatpush.bf16.msra.mxu0 %v2182_v0  ;;  %2294 = vmatpush.bf16.msra.mxu1 %v2182_v0  ;;  %v2179_v3 = vld [vmem:[%s3092_s1 + $0x20] sm:$0xff]  ;;  %v2178_v4 = vld [vmem:[%s3092_s1 + $0x18] sm:$0xff]  ;;  %v2177_v5 = vld [vmem:[%s3092_s1 + $0x10] sm:$0xff] }
   0xd   : > { %2295 = vmatpush.bf16.msra.mxu2 %v2182_v0  ;;  %2296 = vmatpush.bf16.msra.mxu3 %v2182_v0  ;;  %p163_p3 = scmp.lt.s32.totalorder %s162_s22, 39  ;;  %v2176_v6 = vld [vmem:[%s3092_s1 + $0x8] sm:$0xff]  ;;  %v2175_v7 = vld [vmem:[%s3092_s1] sm:$0xff]  ;;  %v2214_v8 = vld [vmem:[%s3092_s1 + $0x138] sm:$0xff]  ;;  %v2477_v36 = vshrl.u32 %v234_v28, 7 }
   0xe   : > { %v2198_v9 = vld [vmem:[%s3092_s1 + $0xb8] sm:$0xff]  ;;  %v2197_v16 = vld [vmem:[%s3092_s1 + $0xb0] sm:$0xff]  ;;  %v2196_v20 = vld [vmem:[%s3092_s1 + $0xa8] sm:$0xff] }
   0xf   : > { %s3100_s22 = smov (!%p163_p3, %s162_s22), 39  ;;  %v2206_v14 = vld [vmem:[%s3092_s1 + $0xf8] sm:$0xff]  ;;  %v2213_v17 = vld [vmem:[%s3092_s1 + $0x130] sm:$0xff]  ;;  %v2212_v21 = vld [vmem:[%s3092_s1 + $0x128] sm:$0xff]  ;;  %vm297_vm0 = vcmp.lt.s32.totalorder %v2477_v36, 6  ;;  %vm236_vm1 = vcmp.lt.s32.totalorder %v2477_v36, 7 }
  0x10   : > { %711 = vmatpush.bf16.msra.mxu0 %v2181_v1  ;;  %2297 = vmatpush.bf16.msra.mxu1 %v2181_v1  ;;  %s1736_s29 = sshll.u32 %s3100_s22, 2  ;;  %v2190_v15 = vld [vmem:[%s3092_s1 + $0x78] sm:$0xff]  ;;  %v2205_v18 = vld [vmem:[%s3092_s1 + $0xf0] sm:$0xff]  ;;  %v2204_v22 = vld [vmem:[%s3092_s1 + $0xe8] sm:$0xff] }
  0x11   : > { %2298 = vmatpush.bf16.msra.mxu2 %v2181_v1  ;;  %2299 = vmatpush.bf16.msra.mxu3 %v2181_v1  ;;  %s2396_s7 = scalar_lea.vmem %s3091_s0, %s1736_s29  ;;  %v2189_v19 = vld [vmem:[%s3092_s1 + $0x70] sm:$0xff]  ;;  %v2195_v23 = vld [vmem:[%s3092_s1 + $0xa0] sm:$0xff]  ;;  %v2188_v24 = vld [vmem:[%s3092_s1 + $0x68] sm:$0xff] }
  0x12   : > { %v2405_v10 = vld [vmem:[%s2396_s7] sm:$0xff]  ;;  %v2408_v11 = vld [vmem:[%s2396_s7 + $0x18] sm:$0xff]  ;;  %v2411_v12 = vld [vmem:[%s2396_s7 + $0x30] sm:$0xff] }
  0x13   : > { %v2414_v13 = vld [vmem:[%s2396_s7 + $0x40] sm:$0xff]  ;;  %v2460_v27 = vld [vmem:[%s2396_s7 + $0x8] sm:$0xff]   ;;  %v2194_v34 = vld [vmem:[%s3092_s1 + $0x98] sm:$0xff] }
  0x14   : > { %712 = vmatpush.bf16.msra.mxu0 %v2180_v2  ;;  %2300 = vmatpush.bf16.msra.mxu1 %v2180_v2  ;;  %v2211_v25 = vld [vmem:[%s3092_s1 + $0x120] sm:$0xff]  ;;  %v196_v33 = vunpack.c.l.bf16 %v2460_v27  ;;  %v2210_v35 = vld [vmem:[%s3092_s1 + $0x118] sm:$0xff]  ;;  %v2480_v37 = vld [vmem:[%s2396_s7 + $0x8] sm:$0xff] }
  0x15   : > { %2301 = vmatpush.bf16.msra.mxu2 %v2180_v2  ;;  %2302 = vmatpush.bf16.msra.mxu3 %v2180_v2  ;;  %v2457_v26 = vld [vmem:[%s2396_s7] sm:$0xff]   ;;  %v2486_v39 = vld [vmem:[%s2396_s7 + $0x38] sm:$0xff]  ;;  %v2489_v40 = vld [vmem:[%s2396_s7 + $0x48] sm:$0xff] }
  0x16   : > { %v2203_v29 = vld [vmem:[%s3092_s1 + $0xe0] sm:$0xff]  ;;  %v194_v31 = vunpack.c.l.bf16 %v2457_v26  ;;  %v195_v32 = vunpack.c.h.bf16 %v2457_v26  ;;  %v2202_v41 = vld [vmem:[%s3092_s1 + $0xd8] sm:$0xff]  ;;  %v2505_v45 = vrot.slane %v196_v33, 2  ;;  %v2193_v46 = vld [vmem:[%s3092_s1 + $0x90] sm:$0xff] }
  0x17   : > { %v2187_v30 = vld [vmem:[%s3092_s1 + $0x60] sm:$0xff]  ;;  %v2186_v42 = vld [vmem:[%s3092_s1 + $0x58] sm:$0xff]  ;;  %v2209_v47 = vld [vmem:[%s3092_s1 + $0x110] sm:$0xff] }
  0x18   : > { %713 = vmatpush.bf16.msra.mxu0 %v2179_v3  ;;  %2303 = vmatpush.bf16.msra.mxu1 %v2179_v3  ;;  %v2483_v38 = vld [vmem:[%s2396_s7 + $0x20] sm:$0xff]  ;;  %v2499_v43 = vrot.slane %v194_v31, 2  ;;  %v278_v44 = vrot.slane %v195_v32, 2  ;;  %v2201_v48 = vld [vmem:[%s3092_s1 + $0xd0] sm:$0xff]  ;;  %v2192_v52 = vld [vmem:[%s3092_s1 + $0x88] sm:$0xff] }
  0x19   : > { %2304 = vmatpush.bf16.msra.mxu2 %v2179_v3  ;;  %2305 = vmatpush.bf16.msra.mxu3 %v2179_v3  ;;  %v2185_v51 = vld [vmem:[%s3092_s1 + $0x50] sm:$0xff]  ;;  %v2208_v53 = vld [vmem:[%s3092_s1 + $0x108] sm:$0xff]  ;;  %v2191_v58 = vld [vmem:[%s3092_s1 + $0x80] sm:$0xff]  ;;  %v197_v3 = vunpack.c.h.bf16 %v2460_v27 }
  0x1a   : > { %v315_v49 = vsel %vm297_vm0, %v278_v44, %v2505_v45  ;;  %v316_v50 = vsel %vm297_vm0, %v2499_v43, %v278_v44  ;;  %v2200_v56 = vld [vmem:[%s3092_s1 + $0xc8] sm:$0xff]  ;;  %v2207_v59 = vld [vmem:[%s3092_s1 + $0x100] sm:$0xff]  ;;  %v2549_v60 = vld [vmem:[%s2396_s7 + $0x10] sm:$0xff]  }
  0x1b   : > { %v318_v54 = vpack.c.bf16 %v316_v50, %v316_v50  ;;  %v319_v55 = vpack.c.bf16 %v315_v49, %v315_v49  ;;  %v2184_v57 = vld [vmem:[%s3092_s1 + $0x48] sm:$0xff]  ;;  %v2230_v61 = vld [vmem:[%s3092_s1 + $0x1b8] sm:$0xff]  ;;  %v2199_v1 = vld [vmem:[%s3092_s1 + $0xc0] sm:$0xff] }
  0x1c   : > { %714 = vmatpush.bf16.msra.mxu0 %v2178_v4  ;;  %2306 = vmatpush.bf16.msra.mxu1 %v2178_v4  ;;  %v2246_v62 = vld [vmem:[%s3092_s1 + $0x238] sm:$0xff]  ;;  %v2183_v2 = vld [vmem:[%s3092_s1 + $0x40] sm:$0xff] }
  0x1d   : > { %2307 = vmatpush.bf16.msra.mxu2 %v2178_v4  ;;  %2308 = vmatpush.bf16.msra.mxu3 %v2178_v4  ;;  %v478_v63 = vunpack.c.l.b16 %v318_v54  ;;  %v479_v0 = vunpack.c.l.b16 %v319_v55  ;;  %v198_v4 = vunpack.c.l.bf16 %v2549_v60  ;;  %v2244_v54 = vld [vmem:[%s3092_s1 + $0x228] sm:$0xff] }
  0x20   : > { %715 = vmatpush.bf16.msra.mxu0 %v2177_v5  ;;  %2309 = vmatpush.bf16.msra.mxu1 %v2177_v5 }
  0x21   : > { %2310 = vmatpush.bf16.msra.mxu2 %v2177_v5  ;;  %2311 = vmatpush.bf16.msra.mxu3 %v2177_v5  ;;  %v2238_v5 = vld [vmem:[%s3092_s1 + $0x1f8] sm:$0xff] }
  0x24   : > { %716 = vmatpush.bf16.msra.mxu0 %v2176_v6  ;;  %2312 = vmatpush.bf16.msra.mxu1 %v2176_v6 }
  0x25   : > { %2313 = vmatpush.bf16.msra.mxu2 %v2176_v6  ;;  %2314 = vmatpush.bf16.msra.mxu3 %v2176_v6  ;;  %v2222_v6 = vld [vmem:[%s3092_s1 + $0x178] sm:$0xff] }
  0x28   : > { %717 = vmatpush.bf16.msra.mxu0 %v2175_v7  ;;  %2315 = vmatpush.bf16.msra.mxu1 %v2175_v7 }
  0x29   : > { %2316 = vmatpush.bf16.msra.mxu2 %v2175_v7  ;;  %2317 = vmatpush.bf16.msra.mxu3 %v2175_v7  ;;  %v2572_v7 = vld [vmem:[%s2396_s7 + $0x10] sm:$0xff] }
  0x2b   : > { %718 = vmatmul.bf16.vlgmr.msra.gmra.mxu0 %v2405_v10  ;;  %733 = vmatmul.bf16.vlgmr.msra.gmra.mxu1 %v2408_v11 }
  0x2c   : > { %1123 = vmatpush.bf16.msrb.mxu0 %v2214_v8  ;;  %748 = vmatmul.bf16.vlgmr.msra.gmra.mxu2 %v2411_v12  ;;  %v2575_v8 = vld [vmem:[%s2396_s7 + $0x28] sm:$0xff] }
  0x2d   : > { %820 = vmatpush.bf16.msrb.mxu2 %v2198_v9  ;;  %758 = vmatmul.bf16.vlgmr.msra.gmra.mxu3 %v2414_v13  ;;  %v2577_v9 = vpack.c.b16 %v479_v0, %v478_v63 }
  0x2e   : > { %1068 = vmatpush.bf16.msrb.mxu3 %v2206_v14  ;;  %765 = vmatpush.bf16.msrb.mxu1 %v2190_v15  ;;  %v2581_v14 = vrot.slane %v194_v31, 1  ;;  %v215_v15 = vrot.slane %v195_v32, 1  ;;  %v2615_v31 = vld [vmem:[%s2396_s7 + $0x18] sm:$0xff]  }
  0x30   : > { %1124 = vmatpush.bf16.msrb.mxu0 %v2213_v17  ;;  %v280_v17 = vrot.slane %v197_v3, 2 }
  0x31   : > { %821 = vmatpush.bf16.msrb.mxu2 %v2197_v16  ;;  %v216_v16 = vrot.slane %v196_v33, 1 }
  0x32   : > { %1069 = vmatpush.bf16.msrb.mxu3 %v2205_v18  ;;  %766 = vmatpush.bf16.msrb.mxu1 %v2189_v19  ;;  %v281_v18 = vrot.slane %v198_v4, 2  ;;  %v2229_v19 = vld [vmem:[%s3092_s1 + $0x1b0] sm:$0xff]  ;;  %v314_v26 = vsel %vm297_vm0, %v2505_v45, %v280_v17 }
  0x34   : > { %1125 = vmatpush.bf16.msrb.mxu0 %v2212_v21  ;;  %v254_v21 = vsel %vm236_vm1, %v215_v15, %v216_v16 }
  0x35   : > { %822 = vmatpush.bf16.msrb.mxu2 %v2196_v20  ;;  %v2237_v20 = vld [vmem:[%s3092_s1 + $0x1f0] sm:$0xff]  ;;  %v258_v28 = vpack.c.bf16 %v254_v21, %v254_v21  ;;  %v2227_v21 = vld [vmem:[%s3092_s1 + $0x1a0] sm:$0xff] }
  0x36   : > { %1070 = vmatpush.bf16.msrb.mxu3 %v2204_v22  ;;  %767 = vmatpush.bf16.msrb.mxu1 %v2188_v24  ;;  %v255_v22 = vsel %vm236_vm1, %v2581_v14, %v215_v15  ;;  %v2221_v24 = vld [vmem:[%s3092_s1 + $0x170] sm:$0xff] }
  0x37   : > { %v257_v27 = vpack.c.bf16 %v255_v22, %v255_v22  ;;  %v419_v33 = vunpack.c.l.b16 %v258_v28  ;;  %v2235_v22 = vld [vmem:[%s3092_s1 + $0x1e0] sm:$0xff] }
  0x38   : > { %1126 = vmatpush.bf16.msrb.mxu0 %v2211_v25  ;;  %v313_v25 = vsel %vm297_vm0, %v280_v17, %v281_v18 }
  0x39   : > { %823 = vmatpush.bf16.msrb.mxu2 %v2195_v23  ;;  %v2245_v23 = vld [vmem:[%s3092_s1 + $0x230] sm:$0xff]  ;;  %v418_v32 = vunpack.c.l.b16 %v257_v27 }
  0x3a   : > { %1071 = vmatpush.bf16.msrb.mxu3 %v2203_v29  ;;  %768 = vmatpush.bf16.msrb.mxu1 %v2187_v30  ;;  %v320_v29 = vpack.c.bf16 %v314_v26, %v314_v26  ;;  %v321_v30 = vpack.c.bf16 %v313_v25, %v313_v25 }
  0x3b   : > { %723 = vmatmul.bf16.gmra.mxu0 %v2480_v37  ;;  %738 = vmatmul.bf16.gmra.mxu1 %v2483_v38  ;;  %v2619_v44 = vpack.c.b16 %v419_v33, %v418_v32 }
  0x3c   : > { %1127 = vmatpush.bf16.msrb.mxu0 %v2210_v35  ;;  %753 = vmatmul.bf16.gmra.mxu2 %v2486_v39  ;;  %v481_v35 = vunpack.c.l.b16 %v321_v30  ;;  %v2678_v30 = vld [vmem:[%s2396_s7 + $0x28] sm:$0xff]  }
  0x3d   : > { %824 = vmatpush.bf16.msrb.mxu2 %v2194_v34  ;;  %761 = vmatmul.bf16.gmra.mxu3 %v2489_v40  ;;  %v480_v34 = vunpack.c.l.b16 %v320_v29 }
  0x3e   : > { %1072 = vmatpush.bf16.msrb.mxu3 %v2202_v41  ;;  %769 = vmatpush.bf16.msrb.mxu1 %v2186_v42  ;;  %v199_v41 = vunpack.c.h.bf16 %v2549_v60  ;;  %v200_v42 = vunpack.c.l.bf16 %v2615_v31 }
  0x3f   : > { %v2621_v45 = vpack.c.b16 %v481_v35, %v480_v34 }
  0x40   : > { %1128 = vmatpush.bf16.msrb.mxu0 %v2209_v47  ;;  %v218_v47 = vrot.slane %v198_v4, 1  ;;  %v283_v49 = vrot.slane %v200_v42, 2  ;;  %v219_v15 = vrot.slane %v199_v41, 1 }
  0x41   : > { %825 = vmatpush.bf16.msrb.mxu2 %v2193_v46  ;;  %v217_v46 = vrot.slane %v197_v3, 1  ;;  %v201_v3 = vunpack.c.h.bf16 %v2615_v31 }
  0x42   : > { %1073 = vmatpush.bf16.msrb.mxu3 %v2201_v48  ;;  %770 = vmatpush.bf16.msrb.mxu1 %v2185_v51  ;;  %v282_v48 = vrot.slane %v199_v41, 2  ;;  %v204_v41 = vunpack.c.l.bf16 %v2678_v30 }
  0x43   : > { %v252_v50 = vsel %vm236_vm1, %v217_v46, %v218_v47  ;;  %v253_v51 = vsel %vm236_vm1, %v216_v16, %v217_v46  ;;  %v220_v16 = vrot.slane %v200_v42, 1  ;;  %v284_v17 = vrot.slane %v201_v3, 2 }
  0x44   : > { %1129 = vmatpush.bf16.msrb.mxu0 %v2208_v53  ;;  %v2236_v53 = vld [vmem:[%s3092_s1 + $0x1e8] sm:$0xff]  ;;  %v311_v55 = vsel %vm297_vm0, %v282_v48, %v283_v49 }
  0x45   : > { %826 = vmatpush.bf16.msrb.mxu2 %v2192_v52  ;;  %v2228_v52 = vld [vmem:[%s3092_s1 + $0x1a8] sm:$0xff]  ;;  %v310_v25 = vsel %vm297_vm0, %v283_v49, %v284_v17 }
  0x46   : > { %1074 = vmatpush.bf16.msrb.mxu3 %v2200_v56  ;;  %771 = vmatpush.bf16.msrb.mxu1 %v2184_v57  ;;  %v312_v56 = vsel %vm297_vm0, %v281_v18, %v282_v48  ;;  %v2220_v57 = vld [vmem:[%s3092_s1 + $0x168] sm:$0xff]  ;;  %v324_v28 = vpack.c.bf16 %v310_v25, %v310_v25 }
  0x47   : > { %v322_v60 = vpack.c.bf16 %v312_v56, %v312_v56 }
  0x48   : > { %1130 = vmatpush.bf16.msrb.mxu0 %v2207_v59  ;;  %v260_v59 = vpack.c.bf16 %v252_v50, %v252_v50  ;;  %v484_v33 = vunpack.c.l.b16 %v324_v28  ;;  %v287_v50 = vrot.slane %v204_v41, 2 }
  0x49   : > { %827 = vmatpush.bf16.msrb.mxu2 %v2191_v58  ;;  %v259_v58 = vpack.c.bf16 %v253_v51, %v253_v51 }
  0x4a   : > { %1075 = vmatpush.bf16.msrb.mxu3 %v2199_v1  ;;  %772 = vmatpush.bf16.msrb.mxu1 %v2183_v2  ;;  %v421_v0 = vunpack.c.l.b16 %v260_v59  ;;  %v482_v1 = vunpack.c.l.b16 %v322_v60 }
  0x4b   : > { %728 = vmatmul.bf16.gmra.mxu0 %v2572_v7  ;;  %743 = vmatmul.bf16.gmra.mxu1 %v2575_v8  ;;  %v420_v63 = vunpack.c.l.b16 %v259_v58 }
  0x4c   : > { %1536 = vmatpush.bf16.msra.mxu0 %v2246_v62  ;;  %828 = vmatmul.bf16.vlgmr.msrb.gmra.mxu2 %v2577_v9  ;;  %v2648_v62 = vld [vmem:[%s2396_s7 + $0x20] sm:$0xff]  }
  0x4d   : > { %1426 = vmatpush.bf16.msra.mxu2 %v2230_v61  ;;  %1076 = vmatmul.bf16.vlgmr.msrb.gmra.mxu3 %v2405_v10  ;;  %v323_v61 = vpack.c.bf16 %v311_v55, %v311_v55  ;;  %v202_v4 = vunpack.c.l.bf16 %v2648_v62  ;;  %v203_v35 = vunpack.c.h.bf16 %v2648_v62  ;;  %v2234_v55 = vld [vmem:[%s3092_s1 + $0x1d8] sm:$0xff]  ;;  %v2708_v62 = vld [vmem:[%s2396_s7 + $0x30] sm:$0xff]  }
  0x4e   : > { %1481 = vmatpush.bf16.msra.mxu3 %v2238_v5  ;;  %1178 = vmatpush.bf16.msra.mxu1 %v2222_v6  ;;  %v2652_v5 = vpack.c.b16 %v421_v0, %v420_v63 }
  0x4f   : > { %v483_v2 = vunpack.c.l.b16 %v323_v61  ;;  %v285_v18 = vrot.slane %v202_v4, 2  ;;  %v222_v48 = vrot.slane %v202_v4, 1  ;;  %v286_v49 = vrot.slane %v203_v35, 2 }
  0x50   : > { %1537 = vmatpush.bf16.msra.mxu0 %v2245_v23  ;;  %v2243_v23 = vld [vmem:[%s3092_s1 + $0x220] sm:$0xff]  ;;  %v206_v4 = vunpack.c.l.bf16 %v2708_v62 }
  0x51   : > { %1427 = vmatpush.bf16.msra.mxu2 %v2229_v19  ;;  %v2654_v6 = vpack.c.b16 %v483_v2, %v482_v1  ;;  %v250_v19 = vsel %vm236_vm1, %v219_v15, %v220_v16  ;;  %v307_v56 = vsel %vm297_vm0, %v286_v49, %v287_v50 }
  0x52   : > { %1482 = vmatpush.bf16.msra.mxu3 %v2237_v20  ;;  %1179 = vmatpush.bf16.msra.mxu1 %v2221_v24  ;;  %v251_v20 = vsel %vm236_vm1, %v218_v47, %v219_v15  ;;  %v309_v24 = vsel %vm297_vm0, %v284_v17, %v285_v18  ;;  %v262_v27 = vpack.c.bf16 %v250_v19, %v250_v19  ;;  %v221_v47 = vrot.slane %v201_v3, 1 }
  0x53   : > { %v261_v26 = vpack.c.bf16 %v251_v20, %v251_v20  ;;  %v325_v29 = vpack.c.bf16 %v309_v24, %v309_v24  ;;  %v327_v61 = vpack.c.bf16 %v307_v56, %v307_v56  ;;  %v205_v3 = vunpack.c.h.bf16 %v2678_v30  ;;  %v2218_v30 = vld [vmem:[%s3092_s1 + $0x158] sm:$0xff] }
  0x54   : > { %1538 = vmatpush.bf16.msra.mxu0 %v2244_v54  ;;  %v423_v32 = vunpack.c.l.b16 %v262_v27  ;;  %v248_v51 = vsel %vm236_vm1, %v221_v47, %v222_v48  ;;  %v2226_v54 = vld [vmem:[%s3092_s1 + $0x198] sm:$0xff]  ;;  %v223_v17 = vrot.slane %v203_v35, 1  ;;  %v289_v20 = vrot.slane %v206_v4, 2 }
  0x55   : > { %1428 = vmatpush.bf16.msra.mxu2 %v2228_v52  ;;  %v422_v31 = vunpack.c.l.b16 %v261_v26  ;;  %v485_v34 = vunpack.c.l.b16 %v325_v29  ;;  %v249_v52 = vsel %vm236_vm1, %v220_v16, %v221_v47  ;;  %v264_v59 = vpack.c.bf16 %v248_v51, %v248_v51 }
  0x56   : > { %1483 = vmatpush.bf16.msra.mxu3 %v2236_v53  ;;  %1180 = vmatpush.bf16.msra.mxu1 %v2220_v57  ;;  %v2219_v53 = vld [vmem:[%s3092_s1 + $0x160] sm:$0xff]  ;;  %v308_v57 = vsel %vm297_vm0, %v285_v18, %v286_v49  ;;  %v263_v58 = vpack.c.bf16 %v249_v52, %v249_v52  ;;  %v487_v2 = vunpack.c.l.b16 %v327_v61  ;;  %v224_v18 = vrot.slane %v204_v41, 1  ;;  %v2225_v49 = vld [vmem:[%s3092_s1 + $0x190] sm:$0xff] }
  0x57   : > { %v2682_v42 = vpack.c.b16 %v423_v32, %v422_v31  ;;  %v2684_v46 = vpack.c.b16 %v485_v34, %v484_v33  ;;  %v326_v60 = vpack.c.bf16 %v308_v57, %v308_v57  ;;  %v425_v0 = vunpack.c.l.b16 %v264_v59  ;;  %v2735_v31 = vld [vmem:[%s2396_s7 + $0x38] sm:$0xff]  }
  0x58   : > { %1539 = vmatpush.bf16.msra.mxu0 %v2243_v23  ;;  %v424_v63 = vunpack.c.l.b16 %v263_v58  ;;  %v288_v19 = vrot.slane %v205_v3, 2  ;;  %v2242_v23 = vld [vmem:[%s3092_s1 + $0x218] sm:$0xff]  ;;  %v207_v41 = vunpack.c.h.bf16 %v2708_v62  ;;  %v208_v47 = vunpack.c.l.bf16 %v2735_v31  ;;  %v2241_v62 = vld [vmem:[%s3092_s1 + $0x210] sm:$0xff] }
  0x59   : > { %1429 = vmatpush.bf16.msra.mxu2 %v2227_v21  ;;  %v486_v1 = vunpack.c.l.b16 %v326_v60  ;;  %v246_v21 = vsel %vm236_vm1, %v223_v17, %v224_v18  ;;  %v225_v52 = vrot.slane %v205_v3, 1 }
  0x5a   : > { %1484 = vmatpush.bf16.msra.mxu3 %v2235_v22  ;;  %1181 = vmatpush.bf16.msra.mxu1 %v2219_v53  ;;  %v2712_v15 = vpack.c.b16 %v425_v0, %v424_v63  ;;  %v247_v22 = vsel %vm236_vm1, %v222_v48, %v223_v17  ;;  %v305_v24 = vsel %vm297_vm0, %v288_v19, %v289_v20  ;;  %v226_v53 = vrot.slane %v206_v4, 1 }
  0x5b   : > { %773 = vmatmul.bf16.vlgmr.msrb.gmra.mxu1 %v2619_v44  ;;  %1131 = vmatmul.bf16.vlgmr.msrb.gmra.mxu0 %v2619_v44  ;;  %v2714_v16 = vpack.c.b16 %v487_v2, %v486_v1  ;;  %v306_v25 = vsel %vm297_vm0, %v287_v50, %v288_v19  ;;  %v265_v26 = vpack.c.bf16 %v247_v22, %v247_v22  ;;  %v2233_v50 = vld [vmem:[%s3092_s1 + $0x1d0] sm:$0xff]  ;;  %v2765_v1 = vld [vmem:[%s2396_s7 + $0x40] sm:$0xff]  }
  0x5c   : > { %833 = vmatmul.bf16.gmra.mxu2 %v2621_v45  ;;  %1540 = vmatpush.bf16.msra.mxu0 %v2242_v23  ;;  %v266_v27 = vpack.c.bf16 %v246_v21, %v246_v21  ;;  %v328_v28 = vpack.c.bf16 %v306_v25, %v306_v25  ;;  %v329_v29 = vpack.c.bf16 %v305_v24, %v305_v24  ;;  %v210_v19 = vunpack.c.l.bf16 %v2765_v1  ;;  %v2217_v21 = vld [vmem:[%s3092_s1 + $0x150] sm:$0xff] }
  0x5d   : > { %1079 = vmatmul.bf16.gmra.mxu3 %v2480_v37  ;;  %1430 = vmatpush.bf16.msra.mxu2 %v2226_v54  ;;  %v426_v32 = vunpack.c.l.b16 %v265_v26  ;;  %v290_v54 = vrot.slane %v207_v41, 2  ;;  %v244_v56 = vsel %vm236_vm1, %v225_v52, %v226_v53  ;;  %v245_v57 = vsel %vm236_vm1, %v224_v18, %v225_v52 }
  0x5e   : > { %1485 = vmatpush.bf16.msra.mxu3 %v2234_v55  ;;  %1182 = vmatpush.bf16.msra.mxu1 %v2218_v30  ;;  %v427_v33 = vunpack.c.l.b16 %v266_v27  ;;  %v488_v34 = vunpack.c.l.b16 %v328_v28  ;;  %v489_v35 = vunpack.c.l.b16 %v329_v29  ;;  %v291_v55 = vrot.slane %v208_v47, 2 }
  0x5f   : > { %v304_v59 = vsel %vm297_vm0, %v289_v20, %v290_v54  ;;  %v267_v60 = vpack.c.bf16 %v245_v57, %v245_v57  ;;  %v268_v61 = vpack.c.bf16 %v244_v56, %v244_v56  ;;  %v209_v18 = vunpack.c.h.bf16 %v2735_v31  ;;  %v2224_v31 = vld [vmem:[%s3092_s1 + $0x188] sm:$0xff] }
  0x60   : > { %v2739_v48 = vpack.c.b16 %v427_v33, %v426_v32  ;;  %v2747_v51 = vpack.c.b16 %v489_v35, %v488_v34  ;;  %v303_v58 = vsel %vm297_vm0, %v290_v54, %v291_v55  ;;  %v330_v63 = vpack.c.bf16 %v304_v59, %v304_v59  ;;  %1541 = vmatpush.bf16.msra.mxu0 %v2241_v62  ;;  %v2232_v32 = vld [vmem:[%s3092_s1 + $0x1c8] sm:$0xff] }
  0x61   : > { %1431 = vmatpush.bf16.msra.mxu2 %v2225_v49  ;;  %v331_v0 = vpack.c.bf16 %v303_v58, %v303_v58  ;;  %v428_v2 = vunpack.c.l.b16 %v267_v60  ;;  %v429_v3 = vunpack.c.l.b16 %v268_v61  ;;  %v227_v25 = vrot.slane %v207_v41, 1  ;;  %v2240_v54 = vld [vmem:[%s3092_s1 + $0x208] sm:$0xff] }
  0x62   : > { %1486 = vmatpush.bf16.msra.mxu3 %v2233_v50  ;;  %v490_v4 = vunpack.c.l.b16 %v330_v63  ;;  %v228_v26 = vrot.slane %v208_v47, 1  ;;  %v292_v27 = vrot.slane %v209_v18, 2  ;;  %v293_v28 = vrot.slane %v210_v19, 2  ;;  %1183 = vmatpush.bf16.msra.mxu1 %v2217_v21  ;;  %v2808_v56 = vld [vmem:[%s2396_s7 + $0x48] sm:$0xff]  }
  0x63   : > { %v491_v17 = vunpack.c.l.b16 %v331_v0  ;;  %v2769_v20 = vpack.c.b16 %v429_v3, %v428_v2  ;;  %v243_v30 = vsel %vm236_vm1, %v226_v53, %v227_v25  ;;  %v211_v60 = vunpack.c.h.bf16 %v2765_v1  ;;  %v2216_v1 = vld [vmem:[%s3092_s1 + $0x148] sm:$0xff] }
  0x64   : > { %v242_v29 = vsel %vm236_vm1, %v227_v25, %v228_v26  ;;  %v301_v33 = vsel %vm297_vm0, %v292_v27, %v293_v28  ;;  %v269_v41 = vpack.c.bf16 %v243_v30, %v243_v30  ;;  %1542 = vmatpush.bf16.msra.mxu0 %v2240_v54  ;;  %v212_v61 = vunpack.c.l.bf16 %v2808_v56 }
  0x65   : > { %v2778_v24 = vpack.c.b16 %v491_v17, %v490_v4  ;;  %1432 = vmatpush.bf16.msra.mxu2 %v2224_v31  ;;  %v270_v47 = vpack.c.bf16 %v242_v29, %v242_v29  ;;  %v333_v53 = vpack.c.bf16 %v301_v33, %v301_v33  ;;  %v229_v17 = vrot.slane %v209_v18, 1 }
  0x66   : > { %1487 = vmatpush.bf16.msra.mxu3 %v2232_v32  ;;  %v230_v21 = vrot.slane %v210_v19, 1  ;;  %v294_v25 = vrot.slane %v211_v60, 2  ;;  %1184 = vmatpush.bf16.msra.mxu1 %v2216_v1 }
  0x67   : > { %v431_v57 = vunpack.c.l.b16 %v270_v47  ;;  %v493_v59 = vunpack.c.l.b16 %v333_v53  ;;  %v241_v18 = vsel %vm236_vm1, %v228_v26, %v229_v17  ;;  %v2231_v26 = vld [vmem:[%s3092_s1 + $0x1c0] sm:$0xff] }
  0x68   : > { %v240_v29 = vsel %vm236_vm1, %v229_v17, %v230_v21  ;;  %v300_v30 = vsel %vm297_vm0, %v293_v28, %v294_v25  ;;  %v271_v33 = vpack.c.bf16 %v241_v18, %v241_v18  ;;  %v2239_v17 = vld [vmem:[%s3092_s1 + $0x200] sm:$0xff]  ;;  %v231_v18 = vrot.slane %v211_v60, 1 }
  0x69   : > { %v334_v47 = vpack.c.bf16 %v300_v30, %v300_v30  ;;  %1543 = vmatpush.bf16.msra.mxu0 %v2239_v17 }
  0x6a   : > { %1488 = vmatpush.bf16.msra.mxu3 %v2231_v26 }
  0x6b   : > { %778 = vmatmul.bf16.gmra.mxu1 %v2652_v5  ;;  %1134 = vmatmul.bf16.gmra.mxu0 %v2652_v5  ;;  %v494_v54 = vunpack.c.l.b16 %v334_v47 }
  0x6c   : > { %838 = vmatmul.bf16.gmra.mxu2 %v2654_v6 }
  0x6d   : > { %1084 = vmatmul.bf16.gmra.mxu3 %v2572_v7 }
  0x7b   : > { %783 = vmatmul.bf16.gmra.mxu1 %v2682_v42  ;;  %1139 = vmatmul.bf16.gmra.mxu0 %v2682_v42 }
  0x7c   : > { %843 = vmatmul.bf16.gmra.mxu2 %v2684_v46 }
  0x7d   : > { %1089 = vmatmul.bf16.gmra.mxu3 %v2408_v11 }
  0x8b   : > { %788 = vmatmul.bf16.gmra.mxu1 %v2712_v15  ;;  %1144 = vmatmul.bf16.gmra.mxu0 %v2712_v15 }
  0x8c   : > { %848 = vmatmul.bf16.gmra.mxu2 %v2714_v16 }
  0x8d   : > { %1094 = vmatmul.bf16.gmra.mxu3 %v2483_v38 }
  0x9b   : > { %793 = vmatmul.bf16.gmra.mxu1 %v2739_v48  ;;  %1149 = vmatmul.bf16.gmra.mxu0 %v2739_v48 }
  0x9c   : > { %853 = vmatmul.bf16.gmra.mxu2 %v2747_v51 }
  0x9d   : > { %1099 = vmatmul.bf16.gmra.mxu3 %v2575_v8 }
  0xa8   : > { %v2774_v22 = vpop.f32.mrf.mxu0  ;;  %v2776_v23 = vpop.f32.mrf.mxu1 }
  0xab   : > { %798 = vmatmul.bf16.gmra.mxu1 %v2769_v20  ;;  %1154 = vmatmul.bf16.gmra.mxu0 %v2769_v20 }
  0xac   : > { %858 = vmatmul.bf16.gmra.mxu2 %v2778_v24 }
  0xad   : > { %1104 = vmatmul.bf16.gmra.mxu3 %v2411_v12  ;;  %v302_v12 = vsel %vm297_vm0, %v291_v55, %v292_v27  ;;  %v430_v55 = vunpack.c.l.b16 %v269_v41  ;;  %v295_v27 = vrot.slane %v212_v61, 2 }
  0xae   : > { %v332_v52 = vpack.c.bf16 %v302_v12, %v302_v12  ;;  %v272_v12 = vpack.c.bf16 %v240_v29, %v240_v29 }
  0xaf   : > { %v2798_v34 = vpop.f32.mrf.mxu2  ;;  %v2814_v0 = vpack.c.b16 %v431_v57, %v430_v55  ;;  %v299_v19 = vsel %vm297_vm0, %v294_v25, %v295_v27  ;;  %v213_v57 = vunpack.c.h.bf16 %v2808_v56 }
  0xb0   : > { %v759_v35 = vpop.f32.mrf.mxu3  ;;  %v2800_v49 = vpop.f32.mrf.mxu0  ;;  %v492_v58 = vunpack.c.l.b16 %v332_v52  ;;  %v335_v28 = vpack.c.bf16 %v299_v19, %v299_v19  ;;  %v432_v52 = vunpack.c.l.b16 %v271_v33  ;;  %v433_v53 = vunpack.c.l.b16 %v272_v12 }
  0xb1   : > { %v2802_v50 = vpop.f32.mrf.mxu1  ;;  %v232_v19 = vrot.slane %v212_v61, 1  ;;  %v296_v30 = vrot.slane %v213_v57, 2 }
  0xb2   : > { %v2820_v4 = vpack.c.b16 %v493_v59, %v492_v58  ;;  %v495_v55 = vunpack.c.l.b16 %v335_v28 }
  0xb3   : > { %v238_v56 = vsel %vm236_vm1, %v231_v18, %v232_v19  ;;  %v298_v60 = vsel %vm297_vm0, %v295_v27, %v296_v30  ;;  %v317_v61 = vsel %vm297_vm0, %v296_v30, %v2499_v43 }
  0xb4   : > { %v2861_v29 = vpack.c.b16 %v495_v55, %v494_v54  ;;  %v274_v26 = vpack.c.bf16 %v238_v56, %v238_v56 }
  0xb6   : > { %3097 = vst [vmem:[#allocation2_spill] sm:$0xff] %v2861_v29 }
  0xb7   : > { %v2812_v62 = vpop.f32.mrf.mxu2 }
  0xb8   : > { %v760_v63 = vpop.f32.mrf.mxu3  ;;  %v2816_v2 = vpop.f32.mrf.mxu0 }
  0xb9   : > { %v2818_v3 = vpop.f32.mrf.mxu1  ;;  %v2852_v63 = vpack.c.b16 %v433_v53, %v432_v52  ;;  %v337_v52 = vpack.c.bf16 %v317_v61, %v317_v61  ;;  %v435_v53 = vunpack.c.l.b16 %v274_v26 }
  0xbb   : > { %803 = vmatmul.bf16.gmra.mxu1 %v2814_v0  ;;  %1159 = vmatmul.bf16.gmra.mxu0 %v2814_v0  ;;  %v497_v55 = vunpack.c.l.b16 %v337_v52 }
  0xbc   : > { %863 = vmatmul.bf16.gmra.mxu2 %v2820_v4 }
  0xbd   : > { %1109 = vmatmul.bf16.gmra.mxu3 %v2486_v39  ;;  %v2223_v39 = vld [vmem:[%s3092_s1 + $0x180] sm:$0xff] }
  0xbe   : > { %1433 = vmatpush.bf16.msra.mxu2 %v2223_v39 }
  0xbf   : > { %v2837_v31 = vpop.f32.mrf.mxu2 }
  0xc0   : > { %v762_v32 = vpop.f32.mrf.mxu3  ;;  %v2845_v35 = vpop.f32.mrf.mxu0 }
  0xc1   : > { %v2847_v41 = vpop.f32.mrf.mxu1  ;;  %v239_v32 = vsel %vm236_vm1, %v230_v21, %v231_v18  ;;  %v336_v21 = vpack.c.bf16 %v298_v60, %v298_v60 }
  0xc2   : > { %v273_v39 = vpack.c.bf16 %v239_v32, %v239_v32  ;;  %v233_v32 = vrot.slane %v213_v57, 1 }
  0xc3   : > { %v496_v54 = vunpack.c.l.b16 %v336_v21 }
  0xc4   : > { %v434_v27 = vunpack.c.l.b16 %v273_v39  ;;  %v237_v60 = vsel %vm236_vm1, %v232_v19, %v233_v32  ;;  %v256_v61 = vsel %vm236_vm1, %v233_v32, %v2581_v14 }
  0xc5   : > { %v2885_v56 = vpack.c.b16 %v497_v55, %v496_v54 }
  0xc6   : > { %v2883_v17 = vpack.c.b16 %v435_v53, %v434_v27 }
  0xc7   : > { %v2850_v58 = vpop.f32.mrf.mxu2 }
  0xc8   : > { %v763_v59 = vpop.f32.mrf.mxu3  ;;  %v2857_v25 = vpop.f32.mrf.mxu0 }
  0xc9   : > { %v2859_v1 = vpop.f32.mrf.mxu1 }
  0xcb   : > { %808 = vmatmul.bf16.gmra.mxu1 %v2852_v63  ;;  %1164 = vmatmul.bf16.gmra.mxu0 %v2852_v63 }
  0xcc   : > { %868 = vmatmul.bf16.gmra.mxu2 %v2861_v29 }
  0xcd   : > { %1114 = vmatmul.bf16.gmra.mxu3 %v2414_v13  ;;  %v2215_v13 = vld [vmem:[%s3092_s1 + $0x140] sm:$0xff] }
  0xce   : > { %1185 = vmatpush.bf16.msra.mxu1 %v2215_v13 }
  0xcf   : > { %v829_v33 = vpop.f32.mrf.mxu2 }
  0xd0   : > { %v1077_v12 = vpop.f32.mrf.mxu3  ;;  %v2879_v47 = vpop.f32.mrf.mxu0 }
  0xd1   : > { %v2881_v28 = vpop.f32.mrf.mxu1 }
  0xd7   : > { %v831_v43 = vpop.f32.mrf.mxu2 }
  0xd8   : > { %v1078_v59 = vpop.f32.mrf.mxu3  ;;  %v1132_v30 = vpop.f32.mrf.mxu0 }
  0xd9   : > { %v774_v18 = vpop.f32.mrf.mxu1 }
  0xda   : > { %v775_v12 = vadd.f32 %v774_v18, %v2774_v22  ;;  %v275_v22 = vpack.c.bf16 %v237_v60, %v237_v60 }
  0xdb   : > { %813 = vmatmul.bf16.gmra.mxu1 %v2883_v17  ;;  %1169 = vmatmul.bf16.gmra.mxu0 %v2883_v17 }
  0xdc   : > { %v2888_v29 = vadd.f32 %v829_v33, %v775_v12  ;;  %871 = vmatmul.bf16.gmra.mxu2 %v2885_v56  ;;  %v276_v33 = vpack.c.bf16 %v256_v61, %v256_v61  ;;  %v436_v27 = vunpack.c.l.b16 %v275_v22 }
  0xdd   : > { %1119 = vmatmul.bf16.gmra.mxu3 %v2489_v40 }
  0xde   : > { %v437_v53 = vunpack.c.l.b16 %v276_v33 }
  0xdf   : > { %v834_v57 = vpop.f32.mrf.mxu2 }
  0xe0   : > { %v1080_v39 = vpop.f32.mrf.mxu3  ;;  %v1133_v13 = vpop.f32.mrf.mxu0  ;;  %v2902_v55 = vpack.c.b16 %v437_v53, %v436_v27 }
  0xe1   : > { %v776_v26 = vpop.f32.mrf.mxu1 }
  0xe2   : > { %v777_v21 = vadd.f32 %v776_v26, %v2800_v49 }
  0xe4   : > { %v2900_v52 = vadd.f32 %v831_v43, %v777_v21 }
  0xe7   : > { %v836_v40 = vpop.f32.mrf.mxu2 }
  0xe8   : > { %v1082_v54 = vpop.f32.mrf.mxu3  ;;  %v1135_v59 = vpop.f32.mrf.mxu0 }
  0xe9   : > { %v779_v19 = vpop.f32.mrf.mxu1  ;;  %v2905_v14 = vadd.f32 %v1135_v59, %v1080_v39 }
  0xea   : > { %v780_v36 = vadd.f32 %v779_v19, %v2816_v2 }
  0xeb   : > { %816 = vmatmul.bf16.gmra.mxu1 %v2902_v55  ;;  %1174 = vmatmul.bf16.gmra.mxu0 %v2902_v55 }
  0xec   : > { %v2907_v18 = vadd.f32 %v834_v57, %v780_v36  ;;  %1434 = vmatmul.bf16.vlgmr.msra.gmra.mxu2 %v2405_v10 }
  0xed   : > { %1489 = vmatmul.bf16.vlgmr.msra.gmra.mxu3 %v2619_v44 }
  0xef   : > { %v839_v49 = vpop.f32.mrf.mxu2 }
  0xf0   : > { %v1085_v43 = vpop.f32.mrf.mxu3  ;;  %v1137_v32 = vpop.f32.mrf.mxu0 }
  0xf1   : > { %v781_v30 = vpop.f32.mrf.mxu1  ;;  %v2914_v60 = vadd.f32 %v1137_v32, %v1082_v54 }
  0xf2   : > { %v782_v12 = vadd.f32 %v781_v30, %v2845_v35 }
  0xf4   : > { %v2916_v2 = vadd.f32 %v836_v40, %v782_v12 }
  0xf7   : > { %v841_v61 = vpop.f32.mrf.mxu2 }
  0xf8   : > { %v1087_v57 = vpop.f32.mrf.mxu3  ;;  %v1140_v22 = vpop.f32.mrf.mxu0 }
  0xf9   : > { %v784_v39 = vpop.f32.mrf.mxu1  ;;  %v2919_v26 = vadd.f32 %v1140_v22, %v1085_v43 }
  0xfa   : > { %v785_v33 = vadd.f32 %v784_v39, %v2857_v25 }
  0xfb   : > { %1186 = vmatmul.bf16.vlgmr.msra.gmra.mxu1 %v2577_v9  ;;  %1544 = vmatmul.bf16.vlgmr.msra.gmra.mxu0 %v2577_v9 }
  0xfc   : > { %v2921_v10 = vadd.f32 %v839_v49, %v785_v33  ;;  %1437 = vmatmul.bf16.gmra.mxu2 %v2480_v37 }
  0xfd   : > { %1492 = vmatmul.bf16.gmra.mxu3 %v2652_v5 }
  0xff   : > { %v844_v44 = vpop.f32.mrf.mxu2 }
 0x100   : > { %v1090_v35 = vpop.f32.mrf.mxu3  ;;  %v1142_v21 = vpop.f32.mrf.mxu0 }
 0x101   : > { %v786_v13 = vpop.f32.mrf.mxu1  ;;  %v2928_v53 = vadd.f32 %v1142_v21, %v1087_v57 }
 0x102   : > { %v787_v27 = vadd.f32 %v786_v13, %v2879_v47 }
 0x104   : > { %v2930_v25 = vadd.f32 %v841_v61, %v787_v27 }
 0x107   : > { %v846_v40 = vpop.f32.mrf.mxu2 }
 0x108   : > { %v1092_v54 = vpop.f32.mrf.mxu3  ;;  %v1145_v59 = vpop.f32.mrf.mxu0 }
 0x109   : > { %v789_v19 = vpop.f32.mrf.mxu1  ;;  %v2933_v36 = vadd.f32 %v1145_v59, %v1090_v35 }
 0x10a   : > { %v790_v9 = vadd.f32 %v789_v19, %v2776_v23 }
 0x10b   : > { %1189 = vmatmul.bf16.gmra.mxu1 %v2621_v45  ;;  %1547 = vmatmul.bf16.gmra.mxu0 %v2621_v45 }
 0x10c   : > { %v2935_v37 = vadd.f32 %v844_v44, %v790_v9  ;;  %1440 = vmatmul.bf16.gmra.mxu2 %v2572_v7 }
 0x10d   : > { %1495 = vmatmul.bf16.gmra.mxu3 %v2682_v42 }
 0x10f   : > { %v849_v5 = vpop.f32.mrf.mxu2 }
 0x110   : > { %v1095_v47 = vpop.f32.mrf.mxu3  ;;  %v1147_v43 = vpop.f32.mrf.mxu0 }
 0x111   : > { %v791_v49 = vpop.f32.mrf.mxu1  ;;  %v2942_v32 = vadd.f32 %v1147_v43, %v1092_v54 }
 0x112   : > { %v792_v30 = vadd.f32 %v791_v49, %v2802_v50 }
 0x114   : > { %v2944_v23 = vadd.f32 %v846_v40, %v792_v30 }
 0x117   : > { %v851_v12 = vpop.f32.mrf.mxu2 }
 0x118   : > { %v1097_v61 = vpop.f32.mrf.mxu3  ;;  %v1150_v39 = vpop.f32.mrf.mxu0 }
 0x119   : > { %v794_v57 = vpop.f32.mrf.mxu1  ;;  %v2947_v22 = vadd.f32 %v1150_v39, %v1095_v47 }
 0x11a   : > { %v795_v45 = vadd.f32 %v794_v57, %v2818_v3 }
 0x11b   : > { %1194 = vmatmul.bf16.gmra.mxu1 %v2654_v6  ;;  %1550 = vmatmul.bf16.gmra.mxu0 %v2654_v6 }
 0x11c   : > { %v2949_v7 = vadd.f32 %v849_v5, %v795_v45  ;;  %1445 = vmatmul.bf16.gmra.mxu2 %v2408_v11 }
 0x11d   : > { %1500 = vmatmul.bf16.gmra.mxu3 %v2712_v15 }
 0x11f   : > { %v854_v42 = vpop.f32.mrf.mxu2 }
 0x120   : > { %v1100_v50 = vpop.f32.mrf.mxu3  ;;  %v1152_v44 = vpop.f32.mrf.mxu0 }
 0x121   : > { %v796_v33 = vpop.f32.mrf.mxu1  ;;  %v2956_v13 = vadd.f32 %v1152_v44, %v1097_v61 }
 0x122   : > { %v797_v35 = vadd.f32 %v796_v33, %v2847_v41 }
 0x124   : > { %v2958_v3 = vadd.f32 %v851_v12, %v797_v35 }
 0x127   : > { %v856_v21 = vpop.f32.mrf.mxu2 }
 0x128   : > { %v1102_v27 = vpop.f32.mrf.mxu3  ;;  %v1155_v54 = vpop.f32.mrf.mxu0 }
 0x129   : > { %v799_v40 = vpop.f32.mrf.mxu1  ;;  %v2961_v19 = vadd.f32 %v1155_v54, %v1100_v50 }
 0x12a   : > { %v800_v6 = vadd.f32 %v799_v40, %v2859_v1 }
 0x12b   : > { %1199 = vmatmul.bf16.gmra.mxu1 %v2684_v46  ;;  %1555 = vmatmul.bf16.gmra.mxu0 %v2684_v46 }
 0x12c   : > { %v2963_v11 = vadd.f32 %v854_v42, %v800_v6  ;;  %1450 = vmatmul.bf16.gmra.mxu2 %v2483_v38 }
 0x12d   : > { %1505 = vmatmul.bf16.gmra.mxu3 %v2739_v48 }
 0x12f   : > { %v859_v15 = vpop.f32.mrf.mxu2 }
 0x130   : > { %v1105_v41 = vpop.f32.mrf.mxu3  ;;  %v1157_v9 = vpop.f32.mrf.mxu0 }
 0x131   : > { %v801_v59 = vpop.f32.mrf.mxu1  ;;  %v2970_v47 = vadd.f32 %v1157_v9, %v1102_v27 }
 0x132   : > { %v802_v5 = vadd.f32 %v801_v59, %v2881_v28 }
 0x134   : > { %v2972_v1 = vadd.f32 %v856_v21, %v802_v5  ;;  %v2327_v21 = vld [vmem:[%s2396_s7 + $0x30] sm:$0xff] }
 0x137   : > { %v861_v49 = vpop.f32.mrf.mxu2 }
 0x138   : > { %v1107_v43 = vpop.f32.mrf.mxu3  ;;  %v1160_v12 = vpop.f32.mrf.mxu0 }
 0x139   : > { %v804_v30 = vpop.f32.mrf.mxu1  ;;  %v2975_v61 = vadd.f32 %v1160_v12, %v1105_v41 }
 0x13a   : > { %v805_v46 = vadd.f32 %v804_v30, %v2798_v34 }
 0x13b   : > { %1204 = vmatmul.bf16.gmra.mxu1 %v2714_v16  ;;  %1560 = vmatmul.bf16.gmra.mxu0 %v2714_v16 }
 0x13c   : > { %v2977_v38 = vadd.f32 %v859_v15, %v805_v46  ;;  %1455 = vmatmul.bf16.gmra.mxu2 %v2575_v8 }
 0x13d   : > { %1510 = vmatmul.bf16.gmra.mxu3 %v2769_v20 }
 0x13f   : > { %v864_v48 = vpop.f32.mrf.mxu2 }
 0x140   : > { %v1110_v28 = vpop.f32.mrf.mxu3  ;;  %v1162_v39 = vpop.f32.mrf.mxu0 }
 0x141   : > { %v806_v57 = vpop.f32.mrf.mxu1  ;;  %v2984_v34 = vadd.f32 %v1162_v39, %v1107_v43 }
 0x142   : > { %v807_v45 = vadd.f32 %v806_v57, %v2812_v62 }
 0x144   : > { %v2986_v42 = vadd.f32 %v861_v49, %v807_v45 }
 0x147   : > { %v866_v50 = vpop.f32.mrf.mxu2 }
 0x148   : > { %v1112_v33 = vpop.f32.mrf.mxu3  ;;  %v1165_v35 = vpop.f32.mrf.mxu0 }
 0x149   : > { %v809_v44 = vpop.f32.mrf.mxu1  ;;  %v2989_v8 = vadd.f32 %v1165_v35, %v1110_v28 }
 0x14a   : > { %v810_v16 = vadd.f32 %v809_v44, %v2837_v31 }
 0x14b   : > { %1209 = vmatmul.bf16.gmra.mxu1 %v2747_v51  ;;  %1565 = vmatmul.bf16.gmra.mxu0 %v2747_v51 }
 0x14c   : > { %v2991_v20 = vadd.f32 %v864_v48, %v810_v16  ;;  %1460 = vmatmul.bf16.gmra.mxu2 %v2327_v21  ;;  %v3098_v21 = vld [vmem:[#allocation2_spill] sm:$0xff] }
 0x14d   : > { %1515 = vmatmul.bf16.gmra.mxu3 %v2814_v0  ;;  %v2328_v0 = vld [vmem:[%s2396_s7 + $0x38] sm:$0xff] }
 0x14f   : > { %v869_v62 = vpop.f32.mrf.mxu2 }
 0x150   : > { %v1115_v27 = vpop.f32.mrf.mxu3  ;;  %v1167_v54 = vpop.f32.mrf.mxu0  ;;  %v2330_v62 = vld [vmem:[%s2396_s7 + $0x48] sm:$0xff] }
 0x151   : > { %v811_v40 = vpop.f32.mrf.mxu1  ;;  %v2998_v31 = vadd.f32 %v1167_v54, %v1112_v33  ;;  %v3021_v54 = vld [vmem:[%s3093_s2] ss:$0 sm:$0xff] }
 0x152   : > { %v812_v6 = vadd.f32 %v811_v40, %v2850_v58 }
 0x154   : > { %v3000_v15 = vadd.f32 %v866_v50, %v812_v6 }
 0x157   : > { %v870_v41 = vpop.f32.mrf.mxu2 }
 0x158   : > { %v1117_v59 = vpop.f32.mrf.mxu3  ;;  %v1170_v5 = vpop.f32.mrf.mxu0 }
 0x159   : > { %v814_v9 = vpop.f32.mrf.mxu1  ;;  %v3002_v51 = vadd.f32 %v1170_v5, %v1115_v27 }
 0x15b   : > { %1214 = vmatmul.bf16.gmra.mxu1 %v2778_v24  ;;  %1570 = vmatmul.bf16.gmra.mxu0 %v2778_v24  ;;  %v2329_v24 = vld [vmem:[%s2396_s7 + $0x40] sm:$0xff]  ;;  %s1737_s7 = sshll.u32 %s1731_s13, 4 }
 0x15c   : > { %1465 = vmatmul.bf16.gmra.mxu2 %v2328_v0  ;;  %v1595_v0 = vadd.f32 %v3021_v54, %v2888_v29  ;;  %p169_p4 = scmp.lt.s32.totalorder %s1737_s7, 31 }
 0x15d   : > { %1520 = vmatmul.bf16.gmra.mxu3 %v2852_v63 }
 0x15e   : > { %s3102_s7 = smov (!%p169_p4, %s1737_s7), 31 }
 0x15f   : > { %v872_v58 = vpop.f32.mrf.mxu2  ;;  %s1738_s13 = sshll.u32 %s3102_s7, 2 }
 0x160   : > { %v1120_v49 = vpop.f32.mrf.mxu3  ;;  %v1172_v30 = vpop.f32.mrf.mxu0  ;;  %s3042_s22 = scalar_lea.vmem %s3094_s3, %s1738_s13 }
 0x161   : > { %v815_v43 = vpop.f32.mrf.mxu1  ;;  %v3008_v12 = vadd.f32 %v1172_v30, %v1117_v59 }
 0x167   : > { %v873_v46 = vpop.f32.mrf.mxu2 }
 0x168   : > { %v1121_v48 = vpop.f32.mrf.mxu3  ;;  %v1175_v57 = vpop.f32.mrf.mxu0 }
 0x169   : > { %v817_v28 = vpop.f32.mrf.mxu1  ;;  %v1596_v48 = vadd.f32 %v3021_v54, %v2900_v52 }
 0x16b   : > { %1219 = vmatmul.bf16.gmra.mxu1 %v2820_v4  ;;  %1575 = vmatmul.bf16.gmra.mxu0 %v2820_v4 }
 0x16c   : > { %1470 = vmatmul.bf16.gmra.mxu2 %v2329_v24 }
 0x16d   : > { %1525 = vmatmul.bf16.gmra.mxu3 %v2883_v17 }
 0x16f   : > { %v1435_v63 = vpop.f32.mrf.mxu2 }
 0x170   : > { %v1490_v39 = vpop.f32.mrf.mxu3  ;;  %v1176_v50 = vpop.f32.mrf.mxu0 }
 0x171   : > { %v818_v45 = vpop.f32.mrf.mxu1 }
 0x177   : > { %v1436_v33 = vpop.f32.mrf.mxu2 }
 0x178   : > { %v1491_v44 = vpop.f32.mrf.mxu3  ;;  %v1545_v16 = vpop.f32.mrf.mxu0 }
 0x179   : > { %v1187_v35 = vpop.f32.mrf.mxu1 }
 0x17b   : > { %1224 = vmatmul.bf16.gmra.mxu1 %v3098_v21  ;;  %1580 = vmatmul.bf16.gmra.mxu0 %v3098_v21  ;;  %v1598_v21 = vadd.f32 %v3021_v54, %v2916_v2  ;;  %v1599_v2 = vadd.f32 %v3021_v54, %v2921_v10 }
 0x17c   : > { %1475 = vmatmul.bf16.gmra.mxu2 %v2330_v62 }
 0x17d   : > { %1530 = vmatmul.bf16.gmra.mxu3 %v2902_v55 }
 0x17f   : > { %v1438_v4 = vpop.f32.mrf.mxu2 }
 0x180   : > { %v1493_v27 = vpop.f32.mrf.mxu3  ;;  %v1546_v17 = vpop.f32.mrf.mxu0 }
 0x181   : > { %v1188_v40 = vpop.f32.mrf.mxu1 }
 0x187   : > { %v1439_v6 = vpop.f32.mrf.mxu2 }
 0x188   : > { %v1494_v41 = vpop.f32.mrf.mxu3  ;;  %v1548_v9 = vpop.f32.mrf.mxu0 }
 0x189   : > { %v1190_v59 = vpop.f32.mrf.mxu1 }
 0x18a   : > { %v1191_v5 = vadd.f32 %v1190_v59, %v2905_v14 }
 0x18b   : > { %1229 = vmatmul.bf16.gmra.mxu1 %v2885_v56  ;;  %1585 = vmatmul.bf16.gmra.mxu0 %v2885_v56  ;;  %v1597_v56 = vadd.f32 %v3021_v54, %v2907_v18 }
 0x18c   : > { %v1611_v55 = vadd.f32 %v1595_v0, %v1191_v5 }
 0x18f   : > { %v1441_v58 = vpop.f32.mrf.mxu2 }
 0x190   : > { %v1496_v49 = vpop.f32.mrf.mxu3  ;;  %v1549_v30 = vpop.f32.mrf.mxu0 }
 0x191   : > { %v1192_v43 = vpop.f32.mrf.mxu1  ;;  %v1497_v39 = vadd.f32 %v1496_v49, %v1441_v58 }
 0x192   : > { %v1193_v46 = vadd.f32 %v1192_v43, %v2914_v60 }
 0x194   : > { %v1612_v28 = vadd.f32 %v1596_v48, %v1193_v46  ;;  %v1600_v46 = vadd.f32 %v3021_v54, %v2930_v25 }
 0x197   : > { %v1443_v14 = vpop.f32.mrf.mxu2 }
 0x198   : > { %v1498_v57 = vpop.f32.mrf.mxu3  ;;  %v1551_v24 = vpop.f32.mrf.mxu0 }
 0x199   : > { %v1195_v29 = vpop.f32.mrf.mxu1  ;;  %v1499_v60 = vadd.f32 %v1498_v57, %v1443_v14  ;;  %v1552_v50 = vadd.f32 %v1551_v24, %v1497_v39  ;;  %v1601_v39 = vadd.f32 %v3021_v54, %v2935_v37 }
 0x19a   : > { %v1196_v63 = vadd.f32 %v1195_v29, %v2919_v26 }
 0x19b   : > { %v1627_v62 = vadd.f32 %v1611_v55, %v1552_v50 }
 0x19c   : > { %v1613_v45 = vadd.f32 %v1597_v56, %v1196_v63 }
 0x19f   : > { %v1446_v33 = vpop.f32.mrf.mxu2 }
 0x1a0   : > { %v1501_v52 = vpop.f32.mrf.mxu3  ;;  %v1553_v35 = vpop.f32.mrf.mxu0 }
 0x1a1   : > { %v1197_v44 = vpop.f32.mrf.mxu1  ;;  %v1554_v26 = vadd.f32 %v1553_v35, %v1499_v60  ;;  %v1502_v59 = vadd.f32 %v1501_v52, %v1446_v33 }
 0x1a2   : > { %v1198_v16 = vadd.f32 %v1197_v44, %v2928_v53 }
 0x1a3   : > { %v1628_v18 = vadd.f32 %v1612_v28, %v1554_v26 }
 0x1a4   : > { %v1614_v4 = vadd.f32 %v1598_v21, %v1198_v16  ;;  %v1602_v16 = vadd.f32 %v3021_v54, %v2944_v23 }
 0x1a5   : > { %v2250_v27 = vpack.c.bf16 %v1628_v18, %v1627_v62 }
 0x1a7   : > { %2251 = vst [vmem:[%s3042_s22] sm:$0xff] %v2250_v27   ;;  %v1448_v40 = vpop.f32.mrf.mxu2 }
 0x1a8   : > { %v1503_v17 = vpop.f32.mrf.mxu3  ;;  %v1556_v53 = vpop.f32.mrf.mxu0 }
 0x1a9   : > { %v1200_v6 = vpop.f32.mrf.mxu1  ;;  %v1504_v5 = vadd.f32 %v1503_v17, %v1448_v40  ;;  %v1557_v0 = vadd.f32 %v1556_v53, %v1502_v59 }
 0x1aa   : > { %v1201_v41 = vadd.f32 %v1200_v6, %v2933_v36  ;;  %v1603_v6 = vadd.f32 %v3021_v54, %v2949_v7 }
 0x1ab   : > { %v1629_v28 = vadd.f32 %v1613_v45, %v1557_v0 }
 0x1ac   : > { %v1615_v9 = vadd.f32 %v1599_v2, %v1201_v41 }
 0x1af   : > { %v1451_v55 = vpop.f32.mrf.mxu2 }
 0x1b0   : > { %v1506_v58 = vpop.f32.mrf.mxu3  ;;  %v1558_v43 = vpop.f32.mrf.mxu0 }
 0x1b1   : > { %v1202_v49 = vpop.f32.mrf.mxu1  ;;  %v1559_v48 = vadd.f32 %v1558_v43, %v1504_v5 }
 0x1b2   : > { %v1203_v30 = vadd.f32 %v1202_v49, %v2942_v32  ;;  %v1507_v32 = vadd.f32 %v1506_v58, %v1451_v55  ;;  %v1604_v55 = vadd.f32 %v3021_v54, %v2958_v3 }
 0x1b3   : > { %v1630_v14 = vadd.f32 %v1614_v4, %v1559_v48 }
 0x1b4   : > { %v1616_v36 = vadd.f32 %v1600_v46, %v1203_v30 }
 0x1b5   : > { %v2255_v57 = vpack.c.bf16 %v1630_v14, %v1629_v28  ;;  %v1605_v14 = vadd.f32 %v3021_v54, %v2963_v11 }
 0x1b7   : > { %2287 = vst [vmem:[%s3042_s22 + $0x8] sm:$0xff] %v2255_v57   ;;  %v1453_v10 = vpop.f32.mrf.mxu2 }
 0x1b8   : > { %v1508_v29 = vpop.f32.mrf.mxu3  ;;  %v1561_v63 = vpop.f32.mrf.mxu0 }
 0x1b9   : > { %v1205_v24 = vpop.f32.mrf.mxu1  ;;  %v1509_v50 = vadd.f32 %v1508_v29, %v1453_v10  ;;  %v1562_v25 = vadd.f32 %v1561_v63, %v1507_v32  ;;  %v1606_v32 = vadd.f32 %v3021_v54, %v2972_v1 }
 0x1ba   : > { %v1206_v56 = vadd.f32 %v1205_v24, %v2947_v22 }
 0x1bb   : > { %v1631_v26 = vadd.f32 %v1615_v9, %v1562_v25 }
 0x1bc   : > { %v1617_v60 = vadd.f32 %v1601_v39, %v1206_v56 }
 0x1bf   : > { %v1456_v33 = vpop.f32.mrf.mxu2 }
 0x1c0   : > { %v1511_v45 = vpop.f32.mrf.mxu3  ;;  %v1563_v44 = vpop.f32.mrf.mxu0 }
 0x1c1   : > { %v1207_v52 = vpop.f32.mrf.mxu1  ;;  %v1564_v21 = vadd.f32 %v1563_v44, %v1509_v50 }
 0x1c2   : > { %v1208_v35 = vadd.f32 %v1207_v52, %v2956_v13  ;;  %v1512_v13 = vadd.f32 %v1511_v45, %v1456_v33 }
 0x1c3   : > { %v1632_v62 = vadd.f32 %v1616_v36, %v1564_v21 }
 0x1c4   : > { %v1618_v22 = vadd.f32 %v1602_v16, %v1208_v35  ;;  %v1607_v16 = vadd.f32 %v3021_v54, %v2977_v38 }
 0x1c5   : > { %v2260_v4 = vpack.c.bf16 %v1632_v62, %v1631_v26 }
 0x1c7   : > { %2288 = vst [vmem:[%s3042_s22 + $0x10] sm:$0xff] %v2260_v4   ;;  %v1458_v37 = vpop.f32.mrf.mxu2 }
 0x1c8   : > { %v1513_v18 = vpop.f32.mrf.mxu3  ;;  %v1566_v40 = vpop.f32.mrf.mxu0 }
 0x1c9   : > { %v1210_v27 = vpop.f32.mrf.mxu1  ;;  %v1514_v41 = vadd.f32 %v1513_v18, %v1458_v37  ;;  %v1567_v23 = vadd.f32 %v1566_v40, %v1512_v13 }
 0x1ca   : > { %v1211_v17 = vadd.f32 %v1210_v27, %v2961_v19  ;;  %v1608_v27 = vadd.f32 %v3021_v54, %v2986_v42 }
 0x1cb   : > { %v1633_v49 = vadd.f32 %v1617_v60, %v1567_v23 }
 0x1cc   : > { %v1619_v53 = vadd.f32 %v1603_v6, %v1211_v17 }
 0x1cf   : > { %v1461_v2 = vpop.f32.mrf.mxu2 }
 0x1d0   : > { %v1516_v59 = vpop.f32.mrf.mxu3  ;;  %v1568_v5 = vpop.f32.mrf.mxu0 }
 0x1d1   : > { %v1212_v9 = vpop.f32.mrf.mxu1  ;;  %v1569_v58 = vadd.f32 %v1568_v5, %v1514_v41 }
 0x1d2   : > { %v1213_v0 = vadd.f32 %v1212_v9, %v2970_v47  ;;  %v1517_v47 = vadd.f32 %v1516_v59, %v1461_v2  ;;  %v1609_v59 = vadd.f32 %v3021_v54, %v2991_v20 }
 0x1d3   : > { %v1634_v43 = vadd.f32 %v1618_v22, %v1569_v58 }
 0x1d4   : > { %v1620_v19 = vadd.f32 %v1604_v55, %v1213_v0 }
 0x1d5   : > { %v2265_v30 = vpack.c.bf16 %v1634_v43, %v1633_v49  ;;  %v1610_v49 = vadd.f32 %v3021_v54, %v3000_v15 }
 0x1d7   : > { %2289 = vst [vmem:[%s3042_s22 + $0x18] sm:$0xff] %v2265_v30   ;;  %v1463_v7 = vpop.f32.mrf.mxu2 }
 0x1d8   : > { %v1518_v46 = vpop.f32.mrf.mxu3  ;;  %v1571_v28 = vpop.f32.mrf.mxu0 }
 0x1d9   : > { %v1215_v48 = vpop.f32.mrf.mxu1  ;;  %v1519_v10 = vadd.f32 %v1518_v46, %v1463_v7  ;;  %v1572_v3 = vadd.f32 %v1571_v28, %v1517_v47 }
 0x1da   : > { %v1216_v36 = vadd.f32 %v1215_v48, %v2975_v61 }
 0x1db   : > { %v1635_v50 = vadd.f32 %v1619_v53, %v1572_v3 }
 0x1dc   : > { %v1621_v57 = vadd.f32 %v1605_v14, %v1216_v36 }
 0x1df   : > { %v1466_v29 = vpop.f32.mrf.mxu2 }
 0x1e0   : > { %v1521_v24 = vpop.f32.mrf.mxu3  ;;  %v1573_v56 = vpop.f32.mrf.mxu0 }
 0x1e1   : > { %v1217_v63 = vpop.f32.mrf.mxu1  ;;  %v1574_v60 = vadd.f32 %v1573_v56, %v1519_v10 }
 0x1e2   : > { %v1218_v39 = vadd.f32 %v1217_v63, %v2984_v34  ;;  %v1522_v34 = vadd.f32 %v1521_v24, %v1466_v29 }
 0x1e3   : > { %v1636_v25 = vadd.f32 %v1620_v19, %v1574_v60 }
 0x1e4   : > { %v1622_v61 = vadd.f32 %v1606_v32, %v1218_v39 }
 0x1e5   : > { %v2270_v33 = vpack.c.bf16 %v1636_v25, %v1635_v50 }
 0x1e7   : > { %2290 = vst [vmem:[%s3042_s22 + $0x20] sm:$0xff] %v2270_v33   ;;  %v1468_v11 = vpop.f32.mrf.mxu2 }
 0x1e8   : > { %v1523_v45 = vpop.f32.mrf.mxu3  ;;  %v1576_v44 = vpop.f32.mrf.mxu0 }
 0x1e9   : > { %v1220_v52 = vpop.f32.mrf.mxu1  ;;  %v1524_v26 = vadd.f32 %v1523_v45, %v1468_v11  ;;  %v1577_v1 = vadd.f32 %v1576_v44, %v1522_v34 }
 0x1ea   : > { %v1221_v35 = vadd.f32 %v1220_v52, %v2989_v8 }
 0x1eb   : > { %v1637_v17 = vadd.f32 %v1621_v57, %v1577_v1 }
 0x1ec   : > { %v1623_v21 = vadd.f32 %v1607_v16, %v1221_v35 }
 0x1ef   : > { %v1471_v22 = vpop.f32.mrf.mxu2 }
 0x1f0   : > { %v1526_v62 = vpop.f32.mrf.mxu3  ;;  %v1578_v37 = vpop.f32.mrf.mxu0 }
 0x1f1   : > { %v1222_v4 = vpop.f32.mrf.mxu1  ;;  %v1579_v40 = vadd.f32 %v1578_v37, %v1524_v26 }
 0x1f2   : > { %v1223_v18 = vadd.f32 %v1222_v4, %v2998_v31  ;;  %v1527_v31 = vadd.f32 %v1526_v62, %v1471_v22 }
 0x1f3   : > { %v1638_v6 = vadd.f32 %v1622_v61, %v1579_v40 }
 0x1f4   : > { %v1624_v8 = vadd.f32 %v1608_v27, %v1223_v18 }
 0x1f5   : > { %v2275_v13 = vpack.c.bf16 %v1638_v6, %v1637_v17 }
 0x1f7   : > { %2291 = vst [vmem:[%s3042_s22 + $0x28] sm:$0xff] %v2275_v13   ;;  %v1473_v38 = vpop.f32.mrf.mxu2 }
 0x1f8   : > { %v1528_v53 = vpop.f32.mrf.mxu3  ;;  %v1581_v23 = vpop.f32.mrf.mxu0 }
 0x1f9   : > { %v1225_v41 = vpop.f32.mrf.mxu1  ;;  %v1529_v5 = vadd.f32 %v1528_v53, %v1473_v38  ;;  %v1582_v42 = vadd.f32 %v1581_v23, %v1527_v31 }
 0x1fa   : > { %v1226_v2 = vadd.f32 %v1225_v41, %v3002_v51 }
 0x1fb   : > { %v1639_v7 = vadd.f32 %v1623_v21, %v1582_v42 }
 0x1fc   : > { %v1625_v9 = vadd.f32 %v1609_v59, %v1226_v2 }
 0x1ff   : > { %v1476_v43 = vpop.f32.mrf.mxu2 }
 0x200   : > { %v1583_v55 = vpop.f32.mrf.mxu0  ;;  %v1531_v30 = vpop.f32.mrf.mxu3 }
 0x201   : > { %v1227_v0 = vpop.f32.mrf.mxu1  ;;  %v1584_v19 = vadd.f32 %v1583_v55, %v1529_v5  ;;  %v1532_v36 = vadd.f32 %v1531_v30, %v1476_v43 }
 0x202   : > { %v1228_v58 = vadd.f32 %v1227_v0, %v3008_v12 }
 0x203   : > { %v1640_v46 = vadd.f32 %v1624_v8, %v1584_v19 }
 0x204   : > { %v1626_v51 = vadd.f32 %v1610_v49, %v1228_v58 }
 0x205   : > { %v2280_v20 = vpack.c.bf16 %v1640_v46, %v1639_v7 }
 0x207   : > { %2292 = vst [vmem:[%s3042_s22 + $0x30] sm:$0xff] %v2280_v20   ;;  %v1478_v14 = vpop.f32.mrf.mxu2 }
 0x208   : > { %v1586_v28 = vpop.f32.mrf.mxu0  ;;  %v1533_v47 = vpop.f32.mrf.mxu3 }
 0x209   : > { %v1230_v48 = vpop.f32.mrf.mxu1  ;;  %v1534_v57 = vadd.f32 %v1533_v47, %v1478_v14  ;;  %v1587_v10 = vadd.f32 %v1586_v28, %v1532_v36 }
 0x20b   : > { %v1641_v15 = vadd.f32 %v1625_v9, %v1587_v10 }
 0x210   : > { %v1588_v3 = vpop.f32.mrf.mxu0 }
 0x211   : > { %v1231_v12 = vpop.f32.mrf.mxu1  ;;  %v1589_v29 = vadd.f32 %v1588_v3, %v1534_v57 }
 0x213   : > { %v1642_v54 = vadd.f32 %v1626_v51, %v1589_v29 }
 0x215   : > { %v2285_v24 = vpack.c.bf16 %v1642_v54, %v1641_v15 }
 0x217   : > { %2293 = vst [vmem:[%s3042_s22 + $0x38] sm:$0xff] %v2285_v24  }
 0x218 PF: > { %s13_s12 = sadd.s32 1, %s2337_s12  }
 0x219   : > { %p10_p5 = scmp.ge.s32.totalorder %s13_s12, 4  }
 0x21b   :  { %12 = sbr.rel (!%p10_p5) target bundleno = 1 (0x1), region = 64 }

// kernel: _forward.1
= control target key start
LH: loop header
LB: loop body
LE: loop exit
PB: predicated region body
PF: predicated region fallthrough
CT: control target
= control target key end

     0   :  { %s2359_s12 = smov 0   ;;  %s3091_s0 = inlined_call_operand.vmem [shape: bf16[320,128], index: 0, kind: input, shape index: {}]   ;;  %s3092_s1 = inlined_call_operand.vmem [shape: bf16[3,384,128], index: 1, kind: input, shape index: {}]   ;;  %s3093_s2 = inlined_call_operand.vmem [shape: f32[1,128], index: 2, kind: input, shape index: {}]   ;;  %s3094_s3 = inlined_call_operand.vmem [shape: bf16[256,128], index: 3, kind: output, shape index: {}]  }
   0x1 LB: > { %s1731_s13 = sadd.s32 4294967295, %s2337_s12   ;;  %p1735_p0 = scmp.ge.s32.totalorder %s2337_s12, 1  ;;  %s2337_s12 = sphi %s2359_s12, %s13_s12  }
   0x2   : > { %p138_p1 = scmp.lt.s32.totalorder %s2337_s12, 3 }
   0x4   : > { %p139_p2 = pnand %p1735_p0, %p138_p1 }
   0x6   : > { %142 = sbr.rel (%p139_p2) target bundleno = 536 (0x218), region = 32 }
   0xb   : > { %v2182_v0 = vld [vmem:[%s3092_s1 + $0x38] sm:$0xff]  ;;  %v2181_v1 = vld [vmem:[%s3092_s1 + $0x30] sm:$0xff]  ;;  %v2180_v2 = vld [vmem:[%s3092_s1 + $0x28] sm:$0xff]  ;;  %s162_s22 = smul.u32 20, %s1731_s13  ;;  %v234_v28 = vlaneseq }
   0xc   : > { %710 = vmatpush.bf16.msra.mxu0 %v2182_v0  ;;  %2294 = vmatpush.bf16.msra.mxu1 %v2182_v0  ;;  %v2179_v3 = vld [vmem:[%s3092_s1 + $0x20] sm:$0xff]  ;;  %v2178_v4 = vld [vmem:[%s3092_s1 + $0x18] sm:$0xff]  ;;  %v2177_v5 = vld [vmem:[%s3092_s1 + $0x10] sm:$0xff] }
   0xd   : > { %2295 = vmatpush.bf16.msra.mxu2 %v2182_v0  ;;  %2296 = vmatpush.bf16.msra.mxu3 %v2182_v0  ;;  %p163_p3 = scmp.lt.s32.totalorder %s162_s22, 39  ;;  %v2176_v6 = vld [vmem:[%s3092_s1 + $0x8] sm:$0xff]  ;;  %v2175_v7 = vld [vmem:[%s3092_s1] sm:$0xff]  ;;  %v2214_v8 = vld [vmem:[%s3092_s1 + $0x138] sm:$0xff]  ;;  %v2477_v36 = vshrl.u32 %v234_v28, 7 }
   0xe   : > { %v2198_v9 = vld [vmem:[%s3092_s1 + $0xb8] sm:$0xff]  ;;  %v2197_v16 = vld [vmem:[%s3092_s1 + $0xb0] sm:$0xff]  ;;  %v2196_v20 = vld [vmem:[%s3092_s1 + $0xa8] sm:$0xff] }
   0xf   : > { %s3100_s22 = smov (!%p163_p3, %s162_s22), 39  ;;  %v2206_v14 = vld [vmem:[%s3092_s1 + $0xf8] sm:$0xff]  ;;  %v2213_v17 = vld [vmem:[%s3092_s1 + $0x130] sm:$0xff]  ;;  %v2212_v21 = vld [vmem:[%s3092_s1 + $0x128] sm:$0xff]  ;;  %vm297_vm0 = vcmp.lt.s32.totalorder %v2477_v36, 6  ;;  %vm236_vm1 = vcmp.lt.s32.totalorder %v2477_v36, 7 }
  0x10   : > { %711 = vmatpush.bf16.msra.mxu0 %v2181_v1  ;;  %2297 = vmatpush.bf16.msra.mxu1 %v2181_v1  ;;  %s1736_s29 = sshll.u32 %s3100_s22, 2  ;;  %v2190_v15 = vld [vmem:[%s3092_s1 + $0x78] sm:$0xff]  ;;  %v2205_v18 = vld [vmem:[%s3092_s1 + $0xf0] sm:$0xff]  ;;  %v2204_v22 = vld [vmem:[%s3092_s1 + $0xe8] sm:$0xff] }
  0x11   : > { %2298 = vmatpush.bf16.msra.mxu2 %v2181_v1  ;;  %2299 = vmatpush.bf16.msra.mxu3 %v2181_v1  ;;  %s2396_s7 = scalar_lea.vmem %s3091_s0, %s1736_s29  ;;  %v2189_v19 = vld [vmem:[%s3092_s1 + $0x70] sm:$0xff]  ;;  %v2195_v23 = vld [vmem:[%s3092_s1 + $0xa0] sm:$0xff]  ;;  %v2188_v24 = vld [vmem:[%s3092_s1 + $0x68] sm:$0xff] }
  0x12   : > { %v2405_v10 = vld [vmem:[%s2396_s7] sm:$0xff]  ;;  %v2408_v11 = vld [vmem:[%s2396_s7 + $0x18] sm:$0xff]  ;;  %v2411_v12 = vld [vmem:[%s2396_s7 + $0x30] sm:$0xff] }
  0x13   : > { %v2414_v13 = vld [vmem:[%s2396_s7 + $0x40] sm:$0xff]  ;;  %v2460_v27 = vld [vmem:[%s2396_s7 + $0x8] sm:$0xff]   ;;  %v2194_v34 = vld [vmem:[%s3092_s1 + $0x98] sm:$0xff] }
  0x14   : > { %712 = vmatpush.bf16.msra.mxu0 %v2180_v2  ;;  %2300 = vmatpush.bf16.msra.mxu1 %v2180_v2  ;;  %v2211_v25 = vld [vmem:[%s3092_s1 + $0x120] sm:$0xff]  ;;  %v196_v33 = vunpack.c.l.bf16 %v2460_v27  ;;  %v2210_v35 = vld [vmem:[%s3092_s1 + $0x118] sm:$0xff]  ;;  %v2480_v37 = vld [vmem:[%s2396_s7 + $0x8] sm:$0xff] }
  0x15   : > { %2301 = vmatpush.bf16.msra.mxu2 %v2180_v2  ;;  %2302 = vmatpush.bf16.msra.mxu3 %v2180_v2  ;;  %v2457_v26 = vld [vmem:[%s2396_s7] sm:$0xff]   ;;  %v2486_v39 = vld [vmem:[%s2396_s7 + $0x38] sm:$0xff]  ;;  %v2489_v40 = vld [vmem:[%s2396_s7 + $0x48] sm:$0xff] }
  0x16   : > { %v2203_v29 = vld [vmem:[%s3092_s1 + $0xe0] sm:$0xff]  ;;  %v194_v31 = vunpack.c.l.bf16 %v2457_v26  ;;  %v195_v32 = vunpack.c.h.bf16 %v2457_v26  ;;  %v2202_v41 = vld [vmem:[%s3092_s1 + $0xd8] sm:$0xff]  ;;  %v2505_v45 = vrot.slane %v196_v33, 2  ;;  %v2193_v46 = vld [vmem:[%s3092_s1 + $0x90] sm:$0xff] }
  0x17   : > { %v2187_v30 = vld [vmem:[%s3092_s1 + $0x60] sm:$0xff]  ;;  %v2186_v42 = vld [vmem:[%s3092_s1 + $0x58] sm:$0xff]  ;;  %v2209_v47 = vld [vmem:[%s3092_s1 + $0x110] sm:$0xff] }
  0x18   : > { %713 = vmatpush.bf16.msra.mxu0 %v2179_v3  ;;  %2303 = vmatpush.bf16.msra.mxu1 %v2179_v3  ;;  %v2483_v38 = vld [vmem:[%s2396_s7 + $0x20] sm:$0xff]  ;;  %v2499_v43 = vrot.slane %v194_v31, 2  ;;  %v278_v44 = vrot.slane %v195_v32, 2  ;;  %v2201_v48 = vld [vmem:[%s3092_s1 + $0xd0] sm:$0xff]  ;;  %v2192_v52 = vld [vmem:[%s3092_s1 + $0x88] sm:$0xff] }
  0x19   : > { %2304 = vmatpush.bf16.msra.mxu2 %v2179_v3  ;;  %2305 = vmatpush.bf16.msra.mxu3 %v2179_v3  ;;  %v2185_v51 = vld [vmem:[%s3092_s1 + $0x50] sm:$0xff]  ;;  %v2208_v53 = vld [vmem:[%s3092_s1 + $0x108] sm:$0xff]  ;;  %v2191_v58 = vld [vmem:[%s3092_s1 + $0x80] sm:$0xff]  ;;  %v197_v3 = vunpack.c.h.bf16 %v2460_v27 }
  0x1a   : > { %v315_v49 = vsel %vm297_vm0, %v278_v44, %v2505_v45  ;;  %v316_v50 = vsel %vm297_vm0, %v2499_v43, %v278_v44  ;;  %v2200_v56 = vld [vmem:[%s3092_s1 + $0xc8] sm:$0xff]  ;;  %v2207_v59 = vld [vmem:[%s3092_s1 + $0x100] sm:$0xff]  ;;  %v2549_v60 = vld [vmem:[%s2396_s7 + $0x10] sm:$0xff]  }
  0x1b   : > { %v318_v54 = vpack.c.bf16 %v316_v50, %v316_v50  ;;  %v319_v55 = vpack.c.bf16 %v315_v49, %v315_v49  ;;  %v2184_v57 = vld [vmem:[%s3092_s1 + $0x48] sm:$0xff]  ;;  %v2230_v61 = vld [vmem:[%s3092_s1 + $0x1b8] sm:$0xff]  ;;  %v2199_v1 = vld [vmem:[%s3092_s1 + $0xc0] sm:$0xff] }
  0x1c   : > { %714 = vmatpush.bf16.msra.mxu0 %v2178_v4  ;;  %2306 = vmatpush.bf16.msra.mxu1 %v2178_v4  ;;  %v2246_v62 = vld [vmem:[%s3092_s1 + $0x238] sm:$0xff]  ;;  %v2183_v2 = vld [vmem:[%s3092_s1 + $0x40] sm:$0xff] }
  0x1d   : > { %2307 = vmatpush.bf16.msra.mxu2 %v2178_v4  ;;  %2308 = vmatpush.bf16.msra.mxu3 %v2178_v4  ;;  %v478_v63 = vunpack.c.l.b16 %v318_v54  ;;  %v479_v0 = vunpack.c.l.b16 %v319_v55  ;;  %v198_v4 = vunpack.c.l.bf16 %v2549_v60  ;;  %v2244_v54 = vld [vmem:[%s3092_s1 + $0x228] sm:$0xff] }
  0x20   : > { %715 = vmatpush.bf16.msra.mxu0 %v2177_v5  ;;  %2309 = vmatpush.bf16.msra.mxu1 %v2177_v5 }
  0x21   : > { %2310 = vmatpush.bf16.msra.mxu2 %v2177_v5  ;;  %2311 = vmatpush.bf16.msra.mxu3 %v2177_v5  ;;  %v2238_v5 = vld [vmem:[%s3092_s1 + $0x1f8] sm:$0xff] }
  0x24   : > { %716 = vmatpush.bf16.msra.mxu0 %v2176_v6  ;;  %2312 = vmatpush.bf16.msra.mxu1 %v2176_v6 }
  0x25   : > { %2313 = vmatpush.bf16.msra.mxu2 %v2176_v6  ;;  %2314 = vmatpush.bf16.msra.mxu3 %v2176_v6  ;;  %v2222_v6 = vld [vmem:[%s3092_s1 + $0x178] sm:$0xff] }
  0x28   : > { %717 = vmatpush.bf16.msra.mxu0 %v2175_v7  ;;  %2315 = vmatpush.bf16.msra.mxu1 %v2175_v7 }
  0x29   : > { %2316 = vmatpush.bf16.msra.mxu2 %v2175_v7  ;;  %2317 = vmatpush.bf16.msra.mxu3 %v2175_v7  ;;  %v2572_v7 = vld [vmem:[%s2396_s7 + $0x10] sm:$0xff] }
  0x2b   : > { %718 = vmatmul.bf16.vlgmr.msra.gmra.mxu0 %v2405_v10  ;;  %733 = vmatmul.bf16.vlgmr.msra.gmra.mxu1 %v2408_v11 }
  0x2c   : > { %1123 = vmatpush.bf16.msrb.mxu0 %v2214_v8  ;;  %748 = vmatmul.bf16.vlgmr.msra.gmra.mxu2 %v2411_v12  ;;  %v2575_v8 = vld [vmem:[%s2396_s7 + $0x28] sm:$0xff] }
  0x2d   : > { %820 = vmatpush.bf16.msrb.mxu2 %v2198_v9  ;;  %758 = vmatmul.bf16.vlgmr.msra.gmra.mxu3 %v2414_v13  ;;  %v2577_v9 = vpack.c.b16 %v479_v0, %v478_v63 }
  0x2e   : > { %1068 = vmatpush.bf16.msrb.mxu3 %v2206_v14  ;;  %765 = vmatpush.bf16.msrb.mxu1 %v2190_v15  ;;  %v2581_v14 = vrot.slane %v194_v31, 1  ;;  %v215_v15 = vrot.slane %v195_v32, 1  ;;  %v2615_v31 = vld [vmem:[%s2396_s7 + $0x18] sm:$0xff]  }
  0x30   : > { %1124 = vmatpush.bf16.msrb.mxu0 %v2213_v17  ;;  %v280_v17 = vrot.slane %v197_v3, 2 }
  0x31   : > { %821 = vmatpush.bf16.msrb.mxu2 %v2197_v16  ;;  %v216_v16 = vrot.slane %v196_v33, 1 }
  0x32   : > { %1069 = vmatpush.bf16.msrb.mxu3 %v2205_v18  ;;  %766 = vmatpush.bf16.msrb.mxu1 %v2189_v19  ;;  %v281_v18 = vrot.slane %v198_v4, 2  ;;  %v2229_v19 = vld [vmem:[%s3092_s1 + $0x1b0] sm:$0xff]  ;;  %v314_v26 = vsel %vm297_vm0, %v2505_v45, %v280_v17 }
  0x34   : > { %1125 = vmatpush.bf16.msrb.mxu0 %v2212_v21  ;;  %v254_v21 = vsel %vm236_vm1, %v215_v15, %v216_v16 }
  0x35   : > { %822 = vmatpush.bf16.msrb.mxu2 %v2196_v20  ;;  %v2237_v20 = vld [vmem:[%s3092_s1 + $0x1f0] sm:$0xff]  ;;  %v258_v28 = vpack.c.bf16 %v254_v21, %v254_v21  ;;  %v2227_v21 = vld [vmem:[%s3092_s1 + $0x1a0] sm:$0xff] }
  0x36   : > { %1070 = vmatpush.bf16.msrb.mxu3 %v2204_v22  ;;  %767 = vmatpush.bf16.msrb.mxu1 %v2188_v24  ;;  %v255_v22 = vsel %vm236_vm1, %v2581_v14, %v215_v15  ;;  %v2221_v24 = vld [vmem:[%s3092_s1 + $0x170] sm:$0xff] }
  0x37   : > { %v257_v27 = vpack.c.bf16 %v255_v22, %v255_v22  ;;  %v419_v33 = vunpack.c.l.b16 %v258_v28  ;;  %v2235_v22 = vld [vmem:[%s3092_s1 + $0x1e0] sm:$0xff] }
  0x38   : > { %1126 = vmatpush.bf16.msrb.mxu0 %v2211_v25  ;;  %v313_v25 = vsel %vm297_vm0, %v280_v17, %v281_v18 }
  0x39   : > { %823 = vmatpush.bf16.msrb.mxu2 %v2195_v23  ;;  %v2245_v23 = vld [vmem:[%s3092_s1 + $0x230] sm:$0xff]  ;;  %v418_v32 = vunpack.c.l.b16 %v257_v27 }
  0x3a   : > { %1071 = vmatpush.bf16.msrb.mxu3 %v2203_v29  ;;  %768 = vmatpush.bf16.msrb.mxu1 %v2187_v30  ;;  %v320_v29 = vpack.c.bf16 %v314_v26, %v314_v26  ;;  %v321_v30 = vpack.c.bf16 %v313_v25, %v313_v25 }
  0x3b   : > { %723 = vmatmul.bf16.gmra.mxu0 %v2480_v37  ;;  %738 = vmatmul.bf16.gmra.mxu1 %v2483_v38  ;;  %v2619_v44 = vpack.c.b16 %v419_v33, %v418_v32 }
  0x3c   : > { %1127 = vmatpush.bf16.msrb.mxu0 %v2210_v35  ;;  %753 = vmatmul.bf16.gmra.mxu2 %v2486_v39  ;;  %v481_v35 = vunpack.c.l.b16 %v321_v30  ;;  %v2678_v30 = vld [vmem:[%s2396_s7 + $0x28] sm:$0xff]  }
  0x3d   : > { %824 = vmatpush.bf16.msrb.mxu2 %v2194_v34  ;;  %761 = vmatmul.bf16.gmra.mxu3 %v2489_v40  ;;  %v480_v34 = vunpack.c.l.b16 %v320_v29 }
  0x3e   : > { %1072 = vmatpush.bf16.msrb.mxu3 %v2202_v41  ;;  %769 = vmatpush.bf16.msrb.mxu1 %v2186_v42  ;;  %v199_v41 = vunpack.c.h.bf16 %v2549_v60  ;;  %v200_v42 = vunpack.c.l.bf16 %v2615_v31 }
  0x3f   : > { %v2621_v45 = vpack.c.b16 %v481_v35, %v480_v34 }
  0x40   : > { %1128 = vmatpush.bf16.msrb.mxu0 %v2209_v47  ;;  %v218_v47 = vrot.slane %v198_v4, 1  ;;  %v283_v49 = vrot.slane %v200_v42, 2  ;;  %v219_v15 = vrot.slane %v199_v41, 1 }
  0x41   : > { %825 = vmatpush.bf16.msrb.mxu2 %v2193_v46  ;;  %v217_v46 = vrot.slane %v197_v3, 1  ;;  %v201_v3 = vunpack.c.h.bf16 %v2615_v31 }
  0x42   : > { %1073 = vmatpush.bf16.msrb.mxu3 %v2201_v48  ;;  %770 = vmatpush.bf16.msrb.mxu1 %v2185_v51  ;;  %v282_v48 = vrot.slane %v199_v41, 2  ;;  %v204_v41 = vunpack.c.l.bf16 %v2678_v30 }
  0x43   : > { %v252_v50 = vsel %vm236_vm1, %v217_v46, %v218_v47  ;;  %v253_v51 = vsel %vm236_vm1, %v216_v16, %v217_v46  ;;  %v220_v16 = vrot.slane %v200_v42, 1  ;;  %v284_v17 = vrot.slane %v201_v3, 2 }
  0x44   : > { %1129 = vmatpush.bf16.msrb.mxu0 %v2208_v53  ;;  %v2236_v53 = vld [vmem:[%s3092_s1 + $0x1e8] sm:$0xff]  ;;  %v311_v55 = vsel %vm297_vm0, %v282_v48, %v283_v49 }
  0x45   : > { %826 = vmatpush.bf16.msrb.mxu2 %v2192_v52  ;;  %v2228_v52 = vld [vmem:[%s3092_s1 + $0x1a8] sm:$0xff]  ;;  %v310_v25 = vsel %vm297_vm0, %v283_v49, %v284_v17 }
  0x46   : > { %1074 = vmatpush.bf16.msrb.mxu3 %v2200_v56  ;;  %771 = vmatpush.bf16.msrb.mxu1 %v2184_v57  ;;  %v312_v56 = vsel %vm297_vm0, %v281_v18, %v282_v48  ;;  %v2220_v57 = vld [vmem:[%s3092_s1 + $0x168] sm:$0xff]  ;;  %v324_v28 = vpack.c.bf16 %v310_v25, %v310_v25 }
  0x47   : > { %v322_v60 = vpack.c.bf16 %v312_v56, %v312_v56 }
  0x48   : > { %1130 = vmatpush.bf16.msrb.mxu0 %v2207_v59  ;;  %v260_v59 = vpack.c.bf16 %v252_v50, %v252_v50  ;;  %v484_v33 = vunpack.c.l.b16 %v324_v28  ;;  %v287_v50 = vrot.slane %v204_v41, 2 }
  0x49   : > { %827 = vmatpush.bf16.msrb.mxu2 %v2191_v58  ;;  %v259_v58 = vpack.c.bf16 %v253_v51, %v253_v51 }
  0x4a   : > { %1075 = vmatpush.bf16.msrb.mxu3 %v2199_v1  ;;  %772 = vmatpush.bf16.msrb.mxu1 %v2183_v2  ;;  %v421_v0 = vunpack.c.l.b16 %v260_v59  ;;  %v482_v1 = vunpack.c.l.b16 %v322_v60 }
  0x4b   : > { %728 = vmatmul.bf16.gmra.mxu0 %v2572_v7  ;;  %743 = vmatmul.bf16.gmra.mxu1 %v2575_v8  ;;  %v420_v63 = vunpack.c.l.b16 %v259_v58 }
  0x4c   : > { %1536 = vmatpush.bf16.msra.mxu0 %v2246_v62  ;;  %828 = vmatmul.bf16.vlgmr.msrb.gmra.mxu2 %v2577_v9  ;;  %v2648_v62 = vld [vmem:[%s2396_s7 + $0x20] sm:$0xff]  }
  0x4d   : > { %1426 = vmatpush.bf16.msra.mxu2 %v2230_v61  ;;  %1076 = vmatmul.bf16.vlgmr.msrb.gmra.mxu3 %v2405_v10  ;;  %v323_v61 = vpack.c.bf16 %v311_v55, %v311_v55  ;;  %v202_v4 = vunpack.c.l.bf16 %v2648_v62  ;;  %v203_v35 = vunpack.c.h.bf16 %v2648_v62  ;;  %v2234_v55 = vld [vmem:[%s3092_s1 + $0x1d8] sm:$0xff]  ;;  %v2708_v62 = vld [vmem:[%s2396_s7 + $0x30] sm:$0xff]  }
  0x4e   : > { %1481 = vmatpush.bf16.msra.mxu3 %v2238_v5  ;;  %1178 = vmatpush.bf16.msra.mxu1 %v2222_v6  ;;  %v2652_v5 = vpack.c.b16 %v421_v0, %v420_v63 }
  0x4f   : > { %v483_v2 = vunpack.c.l.b16 %v323_v61  ;;  %v285_v18 = vrot.slane %v202_v4, 2  ;;  %v222_v48 = vrot.slane %v202_v4, 1  ;;  %v286_v49 = vrot.slane %v203_v35, 2 }
  0x50   : > { %1537 = vmatpush.bf16.msra.mxu0 %v2245_v23  ;;  %v2243_v23 = vld [vmem:[%s3092_s1 + $0x220] sm:$0xff]  ;;  %v206_v4 = vunpack.c.l.bf16 %v2708_v62 }
  0x51   : > { %1427 = vmatpush.bf16.msra.mxu2 %v2229_v19  ;;  %v2654_v6 = vpack.c.b16 %v483_v2, %v482_v1  ;;  %v250_v19 = vsel %vm236_vm1, %v219_v15, %v220_v16  ;;  %v307_v56 = vsel %vm297_vm0, %v286_v49, %v287_v50 }
  0x52   : > { %1482 = vmatpush.bf16.msra.mxu3 %v2237_v20  ;;  %1179 = vmatpush.bf16.msra.mxu1 %v2221_v24  ;;  %v251_v20 = vsel %vm236_vm1, %v218_v47, %v219_v15  ;;  %v309_v24 = vsel %vm297_vm0, %v284_v17, %v285_v18  ;;  %v262_v27 = vpack.c.bf16 %v250_v19, %v250_v19  ;;  %v221_v47 = vrot.slane %v201_v3, 1 }
  0x53   : > { %v261_v26 = vpack.c.bf16 %v251_v20, %v251_v20  ;;  %v325_v29 = vpack.c.bf16 %v309_v24, %v309_v24  ;;  %v327_v61 = vpack.c.bf16 %v307_v56, %v307_v56  ;;  %v205_v3 = vunpack.c.h.bf16 %v2678_v30  ;;  %v2218_v30 = vld [vmem:[%s3092_s1 + $0x158] sm:$0xff] }
  0x54   : > { %1538 = vmatpush.bf16.msra.mxu0 %v2244_v54  ;;  %v423_v32 = vunpack.c.l.b16 %v262_v27  ;;  %v248_v51 = vsel %vm236_vm1, %v221_v47, %v222_v48  ;;  %v2226_v54 = vld [vmem:[%s3092_s1 + $0x198] sm:$0xff]  ;;  %v223_v17 = vrot.slane %v203_v35, 1  ;;  %v289_v20 = vrot.slane %v206_v4, 2 }
  0x55   : > { %1428 = vmatpush.bf16.msra.mxu2 %v2228_v52  ;;  %v422_v31 = vunpack.c.l.b16 %v261_v26  ;;  %v485_v34 = vunpack.c.l.b16 %v325_v29  ;;  %v249_v52 = vsel %vm236_vm1, %v220_v16, %v221_v47  ;;  %v264_v59 = vpack.c.bf16 %v248_v51, %v248_v51 }
  0x56   : > { %1483 = vmatpush.bf16.msra.mxu3 %v2236_v53  ;;  %1180 = vmatpush.bf16.msra.mxu1 %v2220_v57  ;;  %v2219_v53 = vld [vmem:[%s3092_s1 + $0x160] sm:$0xff]  ;;  %v308_v57 = vsel %vm297_vm0, %v285_v18, %v286_v49  ;;  %v263_v58 = vpack.c.bf16 %v249_v52, %v249_v52  ;;  %v487_v2 = vunpack.c.l.b16 %v327_v61  ;;  %v224_v18 = vrot.slane %v204_v41, 1  ;;  %v2225_v49 = vld [vmem:[%s3092_s1 + $0x190] sm:$0xff] }
  0x57   : > { %v2682_v42 = vpack.c.b16 %v423_v32, %v422_v31  ;;  %v2684_v46 = vpack.c.b16 %v485_v34, %v484_v33  ;;  %v326_v60 = vpack.c.bf16 %v308_v57, %v308_v57  ;;  %v425_v0 = vunpack.c.l.b16 %v264_v59  ;;  %v2735_v31 = vld [vmem:[%s2396_s7 + $0x38] sm:$0xff]  }
  0x58   : > { %1539 = vmatpush.bf16.msra.mxu0 %v2243_v23  ;;  %v424_v63 = vunpack.c.l.b16 %v263_v58  ;;  %v288_v19 = vrot.slane %v205_v3, 2  ;;  %v2242_v23 = vld [vmem:[%s3092_s1 + $0x218] sm:$0xff]  ;;  %v207_v41 = vunpack.c.h.bf16 %v2708_v62  ;;  %v208_v47 = vunpack.c.l.bf16 %v2735_v31  ;;  %v2241_v62 = vld [vmem:[%s3092_s1 + $0x210] sm:$0xff] }
  0x59   : > { %1429 = vmatpush.bf16.msra.mxu2 %v2227_v21  ;;  %v486_v1 = vunpack.c.l.b16 %v326_v60  ;;  %v246_v21 = vsel %vm236_vm1, %v223_v17, %v224_v18  ;;  %v225_v52 = vrot.slane %v205_v3, 1 }
  0x5a   : > { %1484 = vmatpush.bf16.msra.mxu3 %v2235_v22  ;;  %1181 = vmatpush.bf16.msra.mxu1 %v2219_v53  ;;  %v2712_v15 = vpack.c.b16 %v425_v0, %v424_v63  ;;  %v247_v22 = vsel %vm236_vm1, %v222_v48, %v223_v17  ;;  %v305_v24 = vsel %vm297_vm0, %v288_v19, %v289_v20  ;;  %v226_v53 = vrot.slane %v206_v4, 1 }
  0x5b   : > { %773 = vmatmul.bf16.vlgmr.msrb.gmra.mxu1 %v2619_v44  ;;  %1131 = vmatmul.bf16.vlgmr.msrb.gmra.mxu0 %v2619_v44  ;;  %v2714_v16 = vpack.c.b16 %v487_v2, %v486_v1  ;;  %v306_v25 = vsel %vm297_vm0, %v287_v50, %v288_v19  ;;  %v265_v26 = vpack.c.bf16 %v247_v22, %v247_v22  ;;  %v2233_v50 = vld [vmem:[%s3092_s1 + $0x1d0] sm:$0xff]  ;;  %v2765_v1 = vld [vmem:[%s2396_s7 + $0x40] sm:$0xff]  }
  0x5c   : > { %833 = vmatmul.bf16.gmra.mxu2 %v2621_v45  ;;  %1540 = vmatpush.bf16.msra.mxu0 %v2242_v23  ;;  %v266_v27 = vpack.c.bf16 %v246_v21, %v246_v21  ;;  %v328_v28 = vpack.c.bf16 %v306_v25, %v306_v25  ;;  %v329_v29 = vpack.c.bf16 %v305_v24, %v305_v24  ;;  %v210_v19 = vunpack.c.l.bf16 %v2765_v1  ;;  %v2217_v21 = vld [vmem:[%s3092_s1 + $0x150] sm:$0xff] }
  0x5d   : > { %1079 = vmatmul.bf16.gmra.mxu3 %v2480_v37  ;;  %1430 = vmatpush.bf16.msra.mxu2 %v2226_v54  ;;  %v426_v32 = vunpack.c.l.b16 %v265_v26  ;;  %v290_v54 = vrot.slane %v207_v41, 2  ;;  %v244_v56 = vsel %vm236_vm1, %v225_v52, %v226_v53  ;;  %v245_v57 = vsel %vm236_vm1, %v224_v18, %v225_v52 }
  0x5e   : > { %1485 = vmatpush.bf16.msra.mxu3 %v2234_v55  ;;  %1182 = vmatpush.bf16.msra.mxu1 %v2218_v30  ;;  %v427_v33 = vunpack.c.l.b16 %v266_v27  ;;  %v488_v34 = vunpack.c.l.b16 %v328_v28  ;;  %v489_v35 = vunpack.c.l.b16 %v329_v29  ;;  %v291_v55 = vrot.slane %v208_v47, 2 }
  0x5f   : > { %v304_v59 = vsel %vm297_vm0, %v289_v20, %v290_v54  ;;  %v267_v60 = vpack.c.bf16 %v245_v57, %v245_v57  ;;  %v268_v61 = vpack.c.bf16 %v244_v56, %v244_v56  ;;  %v209_v18 = vunpack.c.h.bf16 %v2735_v31  ;;  %v2224_v31 = vld [vmem:[%s3092_s1 + $0x188] sm:$0xff] }
  0x60   : > { %v2739_v48 = vpack.c.b16 %v427_v33, %v426_v32  ;;  %v2747_v51 = vpack.c.b16 %v489_v35, %v488_v34  ;;  %v303_v58 = vsel %vm297_vm0, %v290_v54, %v291_v55  ;;  %v330_v63 = vpack.c.bf16 %v304_v59, %v304_v59  ;;  %1541 = vmatpush.bf16.msra.mxu0 %v2241_v62  ;;  %v2232_v32 = vld [vmem:[%s3092_s1 + $0x1c8] sm:$0xff] }
  0x61   : > { %1431 = vmatpush.bf16.msra.mxu2 %v2225_v49  ;;  %v331_v0 = vpack.c.bf16 %v303_v58, %v303_v58  ;;  %v428_v2 = vunpack.c.l.b16 %v267_v60  ;;  %v429_v3 = vunpack.c.l.b16 %v268_v61  ;;  %v227_v25 = vrot.slane %v207_v41, 1  ;;  %v2240_v54 = vld [vmem:[%s3092_s1 + $0x208] sm:$0xff] }
  0x62   : > { %1486 = vmatpush.bf16.msra.mxu3 %v2233_v50  ;;  %v490_v4 = vunpack.c.l.b16 %v330_v63  ;;  %v228_v26 = vrot.slane %v208_v47, 1  ;;  %v292_v27 = vrot.slane %v209_v18, 2  ;;  %v293_v28 = vrot.slane %v210_v19, 2  ;;  %1183 = vmatpush.bf16.msra.mxu1 %v2217_v21  ;;  %v2808_v56 = vld [vmem:[%s2396_s7 + $0x48] sm:$0xff]  }
  0x63   : > { %v491_v17 = vunpack.c.l.b16 %v331_v0  ;;  %v2769_v20 = vpack.c.b16 %v429_v3, %v428_v2  ;;  %v243_v30 = vsel %vm236_vm1, %v226_v53, %v227_v25  ;;  %v211_v60 = vunpack.c.h.bf16 %v2765_v1  ;;  %v2216_v1 = vld [vmem:[%s3092_s1 + $0x148] sm:$0xff] }
  0x64   : > { %v242_v29 = vsel %vm236_vm1, %v227_v25, %v228_v26  ;;  %v301_v33 = vsel %vm297_vm0, %v292_v27, %v293_v28  ;;  %v269_v41 = vpack.c.bf16 %v243_v30, %v243_v30  ;;  %1542 = vmatpush.bf16.msra.mxu0 %v2240_v54  ;;  %v212_v61 = vunpack.c.l.bf16 %v2808_v56 }
  0x65   : > { %v2778_v24 = vpack.c.b16 %v491_v17, %v490_v4  ;;  %1432 = vmatpush.bf16.msra.mxu2 %v2224_v31  ;;  %v270_v47 = vpack.c.bf16 %v242_v29, %v242_v29  ;;  %v333_v53 = vpack.c.bf16 %v301_v33, %v301_v33  ;;  %v229_v17 = vrot.slane %v209_v18, 1 }
  0x66   : > { %1487 = vmatpush.bf16.msra.mxu3 %v2232_v32  ;;  %v230_v21 = vrot.slane %v210_v19, 1  ;;  %v294_v25 = vrot.slane %v211_v60, 2  ;;  %1184 = vmatpush.bf16.msra.mxu1 %v2216_v1 }
  0x67   : > { %v431_v57 = vunpack.c.l.b16 %v270_v47  ;;  %v493_v59 = vunpack.c.l.b16 %v333_v53  ;;  %v241_v18 = vsel %vm236_vm1, %v228_v26, %v229_v17  ;;  %v2231_v26 = vld [vmem:[%s3092_s1 + $0x1c0] sm:$0xff] }
  0x68   : > { %v240_v29 = vsel %vm236_vm1, %v229_v17, %v230_v21  ;;  %v300_v30 = vsel %vm297_vm0, %v293_v28, %v294_v25  ;;  %v271_v33 = vpack.c.bf16 %v241_v18, %v241_v18  ;;  %v2239_v17 = vld [vmem:[%s3092_s1 + $0x200] sm:$0xff]  ;;  %v231_v18 = vrot.slane %v211_v60, 1 }
  0x69   : > { %v334_v47 = vpack.c.bf16 %v300_v30, %v300_v30  ;;  %1543 = vmatpush.bf16.msra.mxu0 %v2239_v17 }
  0x6a   : > { %1488 = vmatpush.bf16.msra.mxu3 %v2231_v26 }
  0x6b   : > { %778 = vmatmul.bf16.gmra.mxu1 %v2652_v5  ;;  %1134 = vmatmul.bf16.gmra.mxu0 %v2652_v5  ;;  %v494_v54 = vunpack.c.l.b16 %v334_v47 }
  0x6c   : > { %838 = vmatmul.bf16.gmra.mxu2 %v2654_v6 }
  0x6d   : > { %1084 = vmatmul.bf16.gmra.mxu3 %v2572_v7 }
  0x7b   : > { %783 = vmatmul.bf16.gmra.mxu1 %v2682_v42  ;;  %1139 = vmatmul.bf16.gmra.mxu0 %v2682_v42 }
  0x7c   : > { %843 = vmatmul.bf16.gmra.mxu2 %v2684_v46 }
  0x7d   : > { %1089 = vmatmul.bf16.gmra.mxu3 %v2408_v11 }
  0x8b   : > { %788 = vmatmul.bf16.gmra.mxu1 %v2712_v15  ;;  %1144 = vmatmul.bf16.gmra.mxu0 %v2712_v15 }
  0x8c   : > { %848 = vmatmul.bf16.gmra.mxu2 %v2714_v16 }
  0x8d   : > { %1094 = vmatmul.bf16.gmra.mxu3 %v2483_v38 }
  0x9b   : > { %793 = vmatmul.bf16.gmra.mxu1 %v2739_v48  ;;  %1149 = vmatmul.bf16.gmra.mxu0 %v2739_v48 }
  0x9c   : > { %853 = vmatmul.bf16.gmra.mxu2 %v2747_v51 }
  0x9d   : > { %1099 = vmatmul.bf16.gmra.mxu3 %v2575_v8 }
  0xa8   : > { %v2774_v22 = vpop.f32.mrf.mxu0  ;;  %v2776_v23 = vpop.f32.mrf.mxu1 }
  0xab   : > { %798 = vmatmul.bf16.gmra.mxu1 %v2769_v20  ;;  %1154 = vmatmul.bf16.gmra.mxu0 %v2769_v20 }
  0xac   : > { %858 = vmatmul.bf16.gmra.mxu2 %v2778_v24 }
  0xad   : > { %1104 = vmatmul.bf16.gmra.mxu3 %v2411_v12  ;;  %v302_v12 = vsel %vm297_vm0, %v291_v55, %v292_v27  ;;  %v430_v55 = vunpack.c.l.b16 %v269_v41  ;;  %v295_v27 = vrot.slane %v212_v61, 2 }
  0xae   : > { %v332_v52 = vpack.c.bf16 %v302_v12, %v302_v12  ;;  %v272_v12 = vpack.c.bf16 %v240_v29, %v240_v29 }
  0xaf   : > { %v2798_v34 = vpop.f32.mrf.mxu2  ;;  %v2814_v0 = vpack.c.b16 %v431_v57, %v430_v55  ;;  %v299_v19 = vsel %vm297_vm0, %v294_v25, %v295_v27  ;;  %v213_v57 = vunpack.c.h.bf16 %v2808_v56 }
  0xb0   : > { %v759_v35 = vpop.f32.mrf.mxu3  ;;  %v2800_v49 = vpop.f32.mrf.mxu0  ;;  %v492_v58 = vunpack.c.l.b16 %v332_v52  ;;  %v335_v28 = vpack.c.bf16 %v299_v19, %v299_v19  ;;  %v432_v52 = vunpack.c.l.b16 %v271_v33  ;;  %v433_v53 = vunpack.c.l.b16 %v272_v12 }
  0xb1   : > { %v2802_v50 = vpop.f32.mrf.mxu1  ;;  %v232_v19 = vrot.slane %v212_v61, 1  ;;  %v296_v30 = vrot.slane %v213_v57, 2 }
  0xb2   : > { %v2820_v4 = vpack.c.b16 %v493_v59, %v492_v58  ;;  %v495_v55 = vunpack.c.l.b16 %v335_v28 }
  0xb3   : > { %v238_v56 = vsel %vm236_vm1, %v231_v18, %v232_v19  ;;  %v298_v60 = vsel %vm297_vm0, %v295_v27, %v296_v30  ;;  %v317_v61 = vsel %vm297_vm0, %v296_v30, %v2499_v43 }
  0xb4   : > { %v2861_v29 = vpack.c.b16 %v495_v55, %v494_v54  ;;  %v274_v26 = vpack.c.bf16 %v238_v56, %v238_v56 }
  0xb6   : > { %3097 = vst [vmem:[#allocation2_spill] sm:$0xff] %v2861_v29 }
  0xb7   : > { %v2812_v62 = vpop.f32.mrf.mxu2 }
  0xb8   : > { %v760_v63 = vpop.f32.mrf.mxu3  ;;  %v2816_v2 = vpop.f32.mrf.mxu0 }
  0xb9   : > { %v2818_v3 = vpop.f32.mrf.mxu1  ;;  %v2852_v63 = vpack.c.b16 %v433_v53, %v432_v52  ;;  %v337_v52 = vpack.c.bf16 %v317_v61, %v317_v61  ;;  %v435_v53 = vunpack.c.l.b16 %v274_v26 }
  0xbb   : > { %803 = vmatmul.bf16.gmra.mxu1 %v2814_v0  ;;  %1159 = vmatmul.bf16.gmra.mxu0 %v2814_v0  ;;  %v497_v55 = vunpack.c.l.b16 %v337_v52 }
  0xbc   : > { %863 = vmatmul.bf16.gmra.mxu2 %v2820_v4 }
  0xbd   : > { %1109 = vmatmul.bf16.gmra.mxu3 %v2486_v39  ;;  %v2223_v39 = vld [vmem:[%s3092_s1 + $0x180] sm:$0xff] }
  0xbe   : > { %1433 = vmatpush.bf16.msra.mxu2 %v2223_v39 }
  0xbf   : > { %v2837_v31 = vpop.f32.mrf.mxu2 }
  0xc0   : > { %v762_v32 = vpop.f32.mrf.mxu3  ;;  %v2845_v35 = vpop.f32.mrf.mxu0 }
  0xc1   : > { %v2847_v41 = vpop.f32.mrf.mxu1  ;;  %v239_v32 = vsel %vm236_vm1, %v230_v21, %v231_v18  ;;  %v336_v21 = vpack.c.bf16 %v298_v60, %v298_v60 }
  0xc2   : > { %v273_v39 = vpack.c.bf16 %v239_v32, %v239_v32  ;;  %v233_v32 = vrot.slane %v213_v57, 1 }
  0xc3   : > { %v496_v54 = vunpack.c.l.b16 %v336_v21 }
  0xc4   : > { %v434_v27 = vunpack.c.l.b16 %v273_v39  ;;  %v237_v60 = vsel %vm236_vm1, %v232_v19, %v233_v32  ;;  %v256_v61 = vsel %vm236_vm1, %v233_v32, %v2581_v14 }
  0xc5   : > { %v2885_v56 = vpack.c.b16 %v497_v55, %v496_v54 }
  0xc6   : > { %v2883_v17 = vpack.c.b16 %v435_v53, %v434_v27 }
  0xc7   : > { %v2850_v58 = vpop.f32.mrf.mxu2 }
  0xc8   : > { %v763_v59 = vpop.f32.mrf.mxu3  ;;  %v2857_v25 = vpop.f32.mrf.mxu0 }
  0xc9   : > { %v2859_v1 = vpop.f32.mrf.mxu1 }
  0xcb   : > { %808 = vmatmul.bf16.gmra.mxu1 %v2852_v63  ;;  %1164 = vmatmul.bf16.gmra.mxu0 %v2852_v63 }
  0xcc   : > { %868 = vmatmul.bf16.gmra.mxu2 %v2861_v29 }
  0xcd   : > { %1114 = vmatmul.bf16.gmra.mxu3 %v2414_v13  ;;  %v2215_v13 = vld [vmem:[%s3092_s1 + $0x140] sm:$0xff] }
  0xce   : > { %1185 = vmatpush.bf16.msra.mxu1 %v2215_v13 }
  0xcf   : > { %v829_v33 = vpop.f32.mrf.mxu2 }
  0xd0   : > { %v1077_v12 = vpop.f32.mrf.mxu3  ;;  %v2879_v47 = vpop.f32.mrf.mxu0 }
  0xd1   : > { %v2881_v28 = vpop.f32.mrf.mxu1 }
  0xd7   : > { %v831_v43 = vpop.f32.mrf.mxu2 }
  0xd8   : > { %v1078_v59 = vpop.f32.mrf.mxu3  ;;  %v1132_v30 = vpop.f32.mrf.mxu0 }
  0xd9   : > { %v774_v18 = vpop.f32.mrf.mxu1 }
  0xda   : > { %v775_v12 = vadd.f32 %v774_v18, %v2774_v22  ;;  %v275_v22 = vpack.c.bf16 %v237_v60, %v237_v60 }
  0xdb   : > { %813 = vmatmul.bf16.gmra.mxu1 %v2883_v17  ;;  %1169 = vmatmul.bf16.gmra.mxu0 %v2883_v17 }
  0xdc   : > { %v2888_v29 = vadd.f32 %v829_v33, %v775_v12  ;;  %871 = vmatmul.bf16.gmra.mxu2 %v2885_v56  ;;  %v276_v33 = vpack.c.bf16 %v256_v61, %v256_v61  ;;  %v436_v27 = vunpack.c.l.b16 %v275_v22 }
  0xdd   : > { %1119 = vmatmul.bf16.gmra.mxu3 %v2489_v40 }
  0xde   : > { %v437_v53 = vunpack.c.l.b16 %v276_v33 }
  0xdf   : > { %v834_v57 = vpop.f32.mrf.mxu2 }
  0xe0   : > { %v1080_v39 = vpop.f32.mrf.mxu3  ;;  %v1133_v13 = vpop.f32.mrf.mxu0  ;;  %v2902_v55 = vpack.c.b16 %v437_v53, %v436_v27 }
  0xe1   : > { %v776_v26 = vpop.f32.mrf.mxu1 }
  0xe2   : > { %v777_v21 = vadd.f32 %v776_v26, %v2800_v49 }
  0xe4   : > { %v2900_v52 = vadd.f32 %v831_v43, %v777_v21 }
  0xe7   : > { %v836_v40 = vpop.f32.mrf.mxu2 }
  0xe8   : > { %v1082_v54 = vpop.f32.mrf.mxu3  ;;  %v1135_v59 = vpop.f32.mrf.mxu0 }
  0xe9   : > { %v779_v19 = vpop.f32.mrf.mxu1  ;;  %v2905_v14 = vadd.f32 %v1135_v59, %v1080_v39 }
  0xea   : > { %v780_v36 = vadd.f32 %v779_v19, %v2816_v2 }
  0xeb   : > { %816 = vmatmul.bf16.gmra.mxu1 %v2902_v55  ;;  %1174 = vmatmul.bf16.gmra.mxu0 %v2902_v55 }
  0xec   : > { %v2907_v18 = vadd.f32 %v834_v57, %v780_v36  ;;  %1434 = vmatmul.bf16.vlgmr.msra.gmra.mxu2 %v2405_v10 }
  0xed   : > { %1489 = vmatmul.bf16.vlgmr.msra.gmra.mxu3 %v2619_v44 }
  0xef   : > { %v839_v49 = vpop.f32.mrf.mxu2 }
  0xf0   : > { %v1085_v43 = vpop.f32.mrf.mxu3  ;;  %v1137_v32 = vpop.f32.mrf.mxu0 }
  0xf1   : > { %v781_v30 = vpop.f32.mrf.mxu1  ;;  %v2914_v60 = vadd.f32 %v1137_v32, %v1082_v54 }
  0xf2   : > { %v782_v12 = vadd.f32 %v781_v30, %v2845_v35 }
  0xf4   : > { %v2916_v2 = vadd.f32 %v836_v40, %v782_v12 }
  0xf7   : > { %v841_v61 = vpop.f32.mrf.mxu2 }
  0xf8   : > { %v1087_v57 = vpop.f32.mrf.mxu3  ;;  %v1140_v22 = vpop.f32.mrf.mxu0 }
  0xf9   : > { %v784_v39 = vpop.f32.mrf.mxu1  ;;  %v2919_v26 = vadd.f32 %v1140_v22, %v1085_v43 }
  0xfa   : > { %v785_v33 = vadd.f32 %v784_v39, %v2857_v25 }
  0xfb   : > { %1186 = vmatmul.bf16.vlgmr.msra.gmra.mxu1 %v2577_v9  ;;  %1544 = vmatmul.bf16.vlgmr.msra.gmra.mxu0 %v2577_v9 }
  0xfc   : > { %v2921_v10 = vadd.f32 %v839_v49, %v785_v33  ;;  %1437 = vmatmul.bf16.gmra.mxu2 %v2480_v37 }
  0xfd   : > { %1492 = vmatmul.bf16.gmra.mxu3 %v2652_v5 }
  0xff   : > { %v844_v44 = vpop.f32.mrf.mxu2 }
 0x100   : > { %v1090_v35 = vpop.f32.mrf.mxu3  ;;  %v1142_v21 = vpop.f32.mrf.mxu0 }
 0x101   : > { %v786_v13 = vpop.f32.mrf.mxu1  ;;  %v2928_v53 = vadd.f32 %v1142_v21, %v1087_v57 }
 0x102   : > { %v787_v27 = vadd.f32 %v786_v13, %v2879_v47 }
 0x104   : > { %v2930_v25 = vadd.f32 %v841_v61, %v787_v27 }
 0x107   : > { %v846_v40 = vpop.f32.mrf.mxu2 }
 0x108   : > { %v1092_v54 = vpop.f32.mrf.mxu3  ;;  %v1145_v59 = vpop.f32.mrf.mxu0 }
 0x109   : > { %v789_v19 = vpop.f32.mrf.mxu1  ;;  %v2933_v36 = vadd.f32 %v1145_v59, %v1090_v35 }
 0x10a   : > { %v790_v9 = vadd.f32 %v789_v19, %v2776_v23 }
 0x10b   : > { %1189 = vmatmul.bf16.gmra.mxu1 %v2621_v45  ;;  %1547 = vmatmul.bf16.gmra.mxu0 %v2621_v45 }
 0x10c   : > { %v2935_v37 = vadd.f32 %v844_v44, %v790_v9  ;;  %1440 = vmatmul.bf16.gmra.mxu2 %v2572_v7 }
 0x10d   : > { %1495 = vmatmul.bf16.gmra.mxu3 %v2682_v42 }
 0x10f   : > { %v849_v5 = vpop.f32.mrf.mxu2 }
 0x110   : > { %v1095_v47 = vpop.f32.mrf.mxu3  ;;  %v1147_v43 = vpop.f32.mrf.mxu0 }
 0x111   : > { %v791_v49 = vpop.f32.mrf.mxu1  ;;  %v2942_v32 = vadd.f32 %v1147_v43, %v1092_v54 }
 0x112   : > { %v792_v30 = vadd.f32 %v791_v49, %v2802_v50 }
 0x114   : > { %v2944_v23 = vadd.f32 %v846_v40, %v792_v30 }
 0x117   : > { %v851_v12 = vpop.f32.mrf.mxu2 }
 0x118   : > { %v1097_v61 = vpop.f32.mrf.mxu3  ;;  %v1150_v39 = vpop.f32.mrf.mxu0 }
 0x119   : > { %v794_v57 = vpop.f32.mrf.mxu1  ;;  %v2947_v22 = vadd.f32 %v1150_v39, %v1095_v47 }
 0x11a   : > { %v795_v45 = vadd.f32 %v794_v57, %v2818_v3 }
 0x11b   : > { %1194 = vmatmul.bf16.gmra.mxu1 %v2654_v6  ;;  %1550 = vmatmul.bf16.gmra.mxu0 %v2654_v6 }
 0x11c   : > { %v2949_v7 = vadd.f32 %v849_v5, %v795_v45  ;;  %1445 = vmatmul.bf16.gmra.mxu2 %v2408_v11 }
 0x11d   : > { %1500 = vmatmul.bf16.gmra.mxu3 %v2712_v15 }
 0x11f   : > { %v854_v42 = vpop.f32.mrf.mxu2 }
 0x120   : > { %v1100_v50 = vpop.f32.mrf.mxu3  ;;  %v1152_v44 = vpop.f32.mrf.mxu0 }
 0x121   : > { %v796_v33 = vpop.f32.mrf.mxu1  ;;  %v2956_v13 = vadd.f32 %v1152_v44, %v1097_v61 }
 0x122   : > { %v797_v35 = vadd.f32 %v796_v33, %v2847_v41 }
 0x124   : > { %v2958_v3 = vadd.f32 %v851_v12, %v797_v35 }
 0x127   : > { %v856_v21 = vpop.f32.mrf.mxu2 }
 0x128   : > { %v1102_v27 = vpop.f32.mrf.mxu3  ;;  %v1155_v54 = vpop.f32.mrf.mxu0 }
 0x129   : > { %v799_v40 = vpop.f32.mrf.mxu1  ;;  %v2961_v19 = vadd.f32 %v1155_v54, %v1100_v50 }
 0x12a   : > { %v800_v6 = vadd.f32 %v799_v40, %v2859_v1 }
 0x12b   : > { %1199 = vmatmul.bf16.gmra.mxu1 %v2684_v46  ;;  %1555 = vmatmul.bf16.gmra.mxu0 %v2684_v46 }
 0x12c   : > { %v2963_v11 = vadd.f32 %v854_v42, %v800_v6  ;;  %1450 = vmatmul.bf16.gmra.mxu2 %v2483_v38 }
 0x12d   : > { %1505 = vmatmul.bf16.gmra.mxu3 %v2739_v48 }
 0x12f   : > { %v859_v15 = vpop.f32.mrf.mxu2 }
 0x130   : > { %v1105_v41 = vpop.f32.mrf.mxu3  ;;  %v1157_v9 = vpop.f32.mrf.mxu0 }
 0x131   : > { %v801_v59 = vpop.f32.mrf.mxu1  ;;  %v2970_v47 = vadd.f32 %v1157_v9, %v1102_v27 }
 0x132   : > { %v802_v5 = vadd.f32 %v801_v59, %v2881_v28 }
 0x134   : > { %v2972_v1 = vadd.f32 %v856_v21, %v802_v5  ;;  %v2327_v21 = vld [vmem:[%s2396_s7 + $0x30] sm:$0xff] }
 0x137   : > { %v861_v49 = vpop.f32.mrf.mxu2 }
 0x138   : > { %v1107_v43 = vpop.f32.mrf.mxu3  ;;  %v1160_v12 = vpop.f32.mrf.mxu0 }
 0x139   : > { %v804_v30 = vpop.f32.mrf.mxu1  ;;  %v2975_v61 = vadd.f32 %v1160_v12, %v1105_v41 }
 0x13a   : > { %v805_v46 = vadd.f32 %v804_v30, %v2798_v34 }
 0x13b   : > { %1204 = vmatmul.bf16.gmra.mxu1 %v2714_v16  ;;  %1560 = vmatmul.bf16.gmra.mxu0 %v2714_v16 }
 0x13c   : > { %v2977_v38 = vadd.f32 %v859_v15, %v805_v46  ;;  %1455 = vmatmul.bf16.gmra.mxu2 %v2575_v8 }
 0x13d   : > { %1510 = vmatmul.bf16.gmra.mxu3 %v2769_v20 }
 0x13f   : > { %v864_v48 = vpop.f32.mrf.mxu2 }
 0x140   : > { %v1110_v28 = vpop.f32.mrf.mxu3  ;;  %v1162_v39 = vpop.f32.mrf.mxu0 }
 0x141   : > { %v806_v57 = vpop.f32.mrf.mxu1  ;;  %v2984_v34 = vadd.f32 %v1162_v39, %v1107_v43 }
 0x142   : > { %v807_v45 = vadd.f32 %v806_v57, %v2812_v62 }
 0x144   : > { %v2986_v42 = vadd.f32 %v861_v49, %v807_v45 }
 0x147   : > { %v866_v50 = vpop.f32.mrf.mxu2 }
 0x148   : > { %v1112_v33 = vpop.f32.mrf.mxu3  ;;  %v1165_v35 = vpop.f32.mrf.mxu0 }
 0x149   : > { %v809_v44 = vpop.f32.mrf.mxu1  ;;  %v2989_v8 = vadd.f32 %v1165_v35, %v1110_v28 }
 0x14a   : > { %v810_v16 = vadd.f32 %v809_v44, %v2837_v31 }
 0x14b   : > { %1209 = vmatmul.bf16.gmra.mxu1 %v2747_v51  ;;  %1565 = vmatmul.bf16.gmra.mxu0 %v2747_v51 }
 0x14c   : > { %v2991_v20 = vadd.f32 %v864_v48, %v810_v16  ;;  %1460 = vmatmul.bf16.gmra.mxu2 %v2327_v21  ;;  %v3098_v21 = vld [vmem:[#allocation2_spill] sm:$0xff] }
 0x14d   : > { %1515 = vmatmul.bf16.gmra.mxu3 %v2814_v0  ;;  %v2328_v0 = vld [vmem:[%s2396_s7 + $0x38] sm:$0xff] }
 0x14f   : > { %v869_v62 = vpop.f32.mrf.mxu2 }
 0x150   : > { %v1115_v27 = vpop.f32.mrf.mxu3  ;;  %v1167_v54 = vpop.f32.mrf.mxu0  ;;  %v2330_v62 = vld [vmem:[%s2396_s7 + $0x48] sm:$0xff] }
 0x151   : > { %v811_v40 = vpop.f32.mrf.mxu1  ;;  %v2998_v31 = vadd.f32 %v1167_v54, %v1112_v33  ;;  %v3021_v54 = vld [vmem:[%s3093_s2] ss:$0 sm:$0xff] }
 0x152   : > { %v812_v6 = vadd.f32 %v811_v40, %v2850_v58 }
 0x154   : > { %v3000_v15 = vadd.f32 %v866_v50, %v812_v6 }
 0x157   : > { %v870_v41 = vpop.f32.mrf.mxu2 }
 0x158   : > { %v1117_v59 = vpop.f32.mrf.mxu3  ;;  %v1170_v5 = vpop.f32.mrf.mxu0 }
 0x159   : > { %v814_v9 = vpop.f32.mrf.mxu1  ;;  %v3002_v51 = vadd.f32 %v1170_v5, %v1115_v27 }
 0x15b   : > { %1214 = vmatmul.bf16.gmra.mxu1 %v2778_v24  ;;  %1570 = vmatmul.bf16.gmra.mxu0 %v2778_v24  ;;  %v2329_v24 = vld [vmem:[%s2396_s7 + $0x40] sm:$0xff]  ;;  %s1737_s7 = sshll.u32 %s1731_s13, 4 }
 0x15c   : > { %1465 = vmatmul.bf16.gmra.mxu2 %v2328_v0  ;;  %v1595_v0 = vadd.f32 %v3021_v54, %v2888_v29  ;;  %p169_p4 = scmp.lt.s32.totalorder %s1737_s7, 31 }
 0x15d   : > { %1520 = vmatmul.bf16.gmra.mxu3 %v2852_v63 }
 0x15e   : > { %s3102_s7 = smov (!%p169_p4, %s1737_s7), 31 }
 0x15f   : > { %v872_v58 = vpop.f32.mrf.mxu2  ;;  %s1738_s13 = sshll.u32 %s3102_s7, 2 }
 0x160   : > { %v1120_v49 = vpop.f32.mrf.mxu3  ;;  %v1172_v30 = vpop.f32.mrf.mxu0  ;;  %s3042_s22 = scalar_lea.vmem %s3094_s3, %s1738_s13 }
 0x161   : > { %v815_v43 = vpop.f32.mrf.mxu1  ;;  %v3008_v12 = vadd.f32 %v1172_v30, %v1117_v59 }
 0x167   : > { %v873_v46 = vpop.f32.mrf.mxu2 }
 0x168   : > { %v1121_v48 = vpop.f32.mrf.mxu3  ;;  %v1175_v57 = vpop.f32.mrf.mxu0 }
 0x169   : > { %v817_v28 = vpop.f32.mrf.mxu1  ;;  %v1596_v48 = vadd.f32 %v3021_v54, %v2900_v52 }
 0x16b   : > { %1219 = vmatmul.bf16.gmra.mxu1 %v2820_v4  ;;  %1575 = vmatmul.bf16.gmra.mxu0 %v2820_v4 }
 0x16c   : > { %1470 = vmatmul.bf16.gmra.mxu2 %v2329_v24 }
 0x16d   : > { %1525 = vmatmul.bf16.gmra.mxu3 %v2883_v17 }
 0x16f   : > { %v1435_v63 = vpop.f32.mrf.mxu2 }
 0x170   : > { %v1490_v39 = vpop.f32.mrf.mxu3  ;;  %v1176_v50 = vpop.f32.mrf.mxu0 }
 0x171   : > { %v818_v45 = vpop.f32.mrf.mxu1 }
 0x177   : > { %v1436_v33 = vpop.f32.mrf.mxu2 }
 0x178   : > { %v1491_v44 = vpop.f32.mrf.mxu3  ;;  %v1545_v16 = vpop.f32.mrf.mxu0 }
 0x179   : > { %v1187_v35 = vpop.f32.mrf.mxu1 }
 0x17b   : > { %1224 = vmatmul.bf16.gmra.mxu1 %v3098_v21  ;;  %1580 = vmatmul.bf16.gmra.mxu0 %v3098_v21  ;;  %v1598_v21 = vadd.f32 %v3021_v54, %v2916_v2  ;;  %v1599_v2 = vadd.f32 %v3021_v54, %v2921_v10 }
 0x17c   : > { %1475 = vmatmul.bf16.gmra.mxu2 %v2330_v62 }
 0x17d   : > { %1530 = vmatmul.bf16.gmra.mxu3 %v2902_v55 }
 0x17f   : > { %v1438_v4 = vpop.f32.mrf.mxu2 }
 0x180   : > { %v1493_v27 = vpop.f32.mrf.mxu3  ;;  %v1546_v17 = vpop.f32.mrf.mxu0 }
 0x181   : > { %v1188_v40 = vpop.f32.mrf.mxu1 }
 0x187   : > { %v1439_v6 = vpop.f32.mrf.mxu2 }
 0x188   : > { %v1494_v41 = vpop.f32.mrf.mxu3  ;;  %v1548_v9 = vpop.f32.mrf.mxu0 }
 0x189   : > { %v1190_v59 = vpop.f32.mrf.mxu1 }
 0x18a   : > { %v1191_v5 = vadd.f32 %v1190_v59, %v2905_v14 }
 0x18b   : > { %1229 = vmatmul.bf16.gmra.mxu1 %v2885_v56  ;;  %1585 = vmatmul.bf16.gmra.mxu0 %v2885_v56  ;;  %v1597_v56 = vadd.f32 %v3021_v54, %v2907_v18 }
 0x18c   : > { %v1611_v55 = vadd.f32 %v1595_v0, %v1191_v5 }
 0x18f   : > { %v1441_v58 = vpop.f32.mrf.mxu2 }
 0x190   : > { %v1496_v49 = vpop.f32.mrf.mxu3  ;;  %v1549_v30 = vpop.f32.mrf.mxu0 }
 0x191   : > { %v1192_v43 = vpop.f32.mrf.mxu1  ;;  %v1497_v39 = vadd.f32 %v1496_v49, %v1441_v58 }
 0x192   : > { %v1193_v46 = vadd.f32 %v1192_v43, %v2914_v60 }
 0x194   : > { %v1612_v28 = vadd.f32 %v1596_v48, %v1193_v46  ;;  %v1600_v46 = vadd.f32 %v3021_v54, %v2930_v25 }
 0x197   : > { %v1443_v14 = vpop.f32.mrf.mxu2 }
 0x198   : > { %v1498_v57 = vpop.f32.mrf.mxu3  ;;  %v1551_v24 = vpop.f32.mrf.mxu0 }
 0x199   : > { %v1195_v29 = vpop.f32.mrf.mxu1  ;;  %v1499_v60 = vadd.f32 %v1498_v57, %v1443_v14  ;;  %v1552_v50 = vadd.f32 %v1551_v24, %v1497_v39  ;;  %v1601_v39 = vadd.f32 %v3021_v54, %v2935_v37 }
 0x19a   : > { %v1196_v63 = vadd.f32 %v1195_v29, %v2919_v26 }
 0x19b   : > { %v1627_v62 = vadd.f32 %v1611_v55, %v1552_v50 }
 0x19c   : > { %v1613_v45 = vadd.f32 %v1597_v56, %v1196_v63 }
 0x19f   : > { %v1446_v33 = vpop.f32.mrf.mxu2 }
 0x1a0   : > { %v1501_v52 = vpop.f32.mrf.mxu3  ;;  %v1553_v35 = vpop.f32.mrf.mxu0 }
 0x1a1   : > { %v1197_v44 = vpop.f32.mrf.mxu1  ;;  %v1554_v26 = vadd.f32 %v1553_v35, %v1499_v60  ;;  %v1502_v59 = vadd.f32 %v1501_v52, %v1446_v33 }
 0x1a2   : > { %v1198_v16 = vadd.f32 %v1197_v44, %v2928_v53 }
 0x1a3   : > { %v1628_v18 = vadd.f32 %v1612_v28, %v1554_v26 }
 0x1a4   : > { %v1614_v4 = vadd.f32 %v1598_v21, %v1198_v16  ;;  %v1602_v16 = vadd.f32 %v3021_v54, %v2944_v23 }
 0x1a5   : > { %v2250_v27 = vpack.c.bf16 %v1628_v18, %v1627_v62 }
 0x1a7   : > { %2251 = vst [vmem:[%s3042_s22] sm:$0xff] %v2250_v27   ;;  %v1448_v40 = vpop.f32.mrf.mxu2 }
 0x1a8   : > { %v1503_v17 = vpop.f32.mrf.mxu3  ;;  %v1556_v53 = vpop.f32.mrf.mxu0 }
 0x1a9   : > { %v1200_v6 = vpop.f32.mrf.mxu1  ;;  %v1504_v5 = vadd.f32 %v1503_v17, %v1448_v40  ;;  %v1557_v0 = vadd.f32 %v1556_v53, %v1502_v59 }
 0x1aa   : > { %v1201_v41 = vadd.f32 %v1200_v6, %v2933_v36  ;;  %v1603_v6 = vadd.f32 %v3021_v54, %v2949_v7 }
 0x1ab   : > { %v1629_v28 = vadd.f32 %v1613_v45, %v1557_v0 }
 0x1ac   : > { %v1615_v9 = vadd.f32 %v1599_v2, %v1201_v41 }
 0x1af   : > { %v1451_v55 = vpop.f32.mrf.mxu2 }
 0x1b0   : > { %v1506_v58 = vpop.f32.mrf.mxu3  ;;  %v1558_v43 = vpop.f32.mrf.mxu0 }
 0x1b1   : > { %v1202_v49 = vpop.f32.mrf.mxu1  ;;  %v1559_v48 = vadd.f32 %v1558_v43, %v1504_v5 }
 0x1b2   : > { %v1203_v30 = vadd.f32 %v1202_v49, %v2942_v32  ;;  %v1507_v32 = vadd.f32 %v1506_v58, %v1451_v55  ;;  %v1604_v55 = vadd.f32 %v3021_v54, %v2958_v3 }
 0x1b3   : > { %v1630_v14 = vadd.f32 %v1614_v4, %v1559_v48 }
 0x1b4   : > { %v1616_v36 = vadd.f32 %v1600_v46, %v1203_v30 }
 0x1b5   : > { %v2255_v57 = vpack.c.bf16 %v1630_v14, %v1629_v28  ;;  %v1605_v14 = vadd.f32 %v3021_v54, %v2963_v11 }
 0x1b7   : > { %2287 = vst [vmem:[%s3042_s22 + $0x8] sm:$0xff] %v2255_v57   ;;  %v1453_v10 = vpop.f32.mrf.mxu2 }
 0x1b8   : > { %v1508_v29 = vpop.f32.mrf.mxu3  ;;  %v1561_v63 = vpop.f32.mrf.mxu0 }
 0x1b9   : > { %v1205_v24 = vpop.f32.mrf.mxu1  ;;  %v1509_v50 = vadd.f32 %v1508_v29, %v1453_v10  ;;  %v1562_v25 = vadd.f32 %v1561_v63, %v1507_v32  ;;  %v1606_v32 = vadd.f32 %v3021_v54, %v2972_v1 }
 0x1ba   : > { %v1206_v56 = vadd.f32 %v1205_v24, %v2947_v22 }
 0x1bb   : > { %v1631_v26 = vadd.f32 %v1615_v9, %v1562_v25 }
 0x1bc   : > { %v1617_v60 = vadd.f32 %v1601_v39, %v1206_v56 }
 0x1bf   : > { %v1456_v33 = vpop.f32.mrf.mxu2 }
 0x1c0   : > { %v1511_v45 = vpop.f32.mrf.mxu3  ;;  %v1563_v44 = vpop.f32.mrf.mxu0 }
 0x1c1   : > { %v1207_v52 = vpop.f32.mrf.mxu1  ;;  %v1564_v21 = vadd.f32 %v1563_v44, %v1509_v50 }
 0x1c2   : > { %v1208_v35 = vadd.f32 %v1207_v52, %v2956_v13  ;;  %v1512_v13 = vadd.f32 %v1511_v45, %v1456_v33 }
 0x1c3   : > { %v1632_v62 = vadd.f32 %v1616_v36, %v1564_v21 }
 0x1c4   : > { %v1618_v22 = vadd.f32 %v1602_v16, %v1208_v35  ;;  %v1607_v16 = vadd.f32 %v3021_v54, %v2977_v38 }
 0x1c5   : > { %v2260_v4 = vpack.c.bf16 %v1632_v62, %v1631_v26 }
 0x1c7   : > { %2288 = vst [vmem:[%s3042_s22 + $0x10] sm:$0xff] %v2260_v4   ;;  %v1458_v37 = vpop.f32.mrf.mxu2 }
 0x1c8   : > { %v1513_v18 = vpop.f32.mrf.mxu3  ;;  %v1566_v40 = vpop.f32.mrf.mxu0 }
 0x1c9   : > { %v1210_v27 = vpop.f32.mrf.mxu1  ;;  %v1514_v41 = vadd.f32 %v1513_v18, %v1458_v37  ;;  %v1567_v23 = vadd.f32 %v1566_v40, %v1512_v13 }
 0x1ca   : > { %v1211_v17 = vadd.f32 %v1210_v27, %v2961_v19  ;;  %v1608_v27 = vadd.f32 %v3021_v54, %v2986_v42 }
 0x1cb   : > { %v1633_v49 = vadd.f32 %v1617_v60, %v1567_v23 }
 0x1cc   : > { %v1619_v53 = vadd.f32 %v1603_v6, %v1211_v17 }
 0x1cf   : > { %v1461_v2 = vpop.f32.mrf.mxu2 }
 0x1d0   : > { %v1516_v59 = vpop.f32.mrf.mxu3  ;;  %v1568_v5 = vpop.f32.mrf.mxu0 }
 0x1d1   : > { %v1212_v9 = vpop.f32.mrf.mxu1  ;;  %v1569_v58 = vadd.f32 %v1568_v5, %v1514_v41 }
 0x1d2   : > { %v1213_v0 = vadd.f32 %v1212_v9, %v2970_v47  ;;  %v1517_v47 = vadd.f32 %v1516_v59, %v1461_v2  ;;  %v1609_v59 = vadd.f32 %v3021_v54, %v2991_v20 }
 0x1d3   : > { %v1634_v43 = vadd.f32 %v1618_v22, %v1569_v58 }
 0x1d4   : > { %v1620_v19 = vadd.f32 %v1604_v55, %v1213_v0 }
 0x1d5   : > { %v2265_v30 = vpack.c.bf16 %v1634_v43, %v1633_v49  ;;  %v1610_v49 = vadd.f32 %v3021_v54, %v3000_v15 }
 0x1d7   : > { %2289 = vst [vmem:[%s3042_s22 + $0x18] sm:$0xff] %v2265_v30   ;;  %v1463_v7 = vpop.f32.mrf.mxu2 }
 0x1d8   : > { %v1518_v46 = vpop.f32.mrf.mxu3  ;;  %v1571_v28 = vpop.f32.mrf.mxu0 }
 0x1d9   : > { %v1215_v48 = vpop.f32.mrf.mxu1  ;;  %v1519_v10 = vadd.f32 %v1518_v46, %v1463_v7  ;;  %v1572_v3 = vadd.f32 %v1571_v28, %v1517_v47 }
 0x1da   : > { %v1216_v36 = vadd.f32 %v1215_v48, %v2975_v61 }
 0x1db   : > { %v1635_v50 = vadd.f32 %v1619_v53, %v1572_v3 }
 0x1dc   : > { %v1621_v57 = vadd.f32 %v1605_v14, %v1216_v36 }
 0x1df   : > { %v1466_v29 = vpop.f32.mrf.mxu2 }
 0x1e0   : > { %v1521_v24 = vpop.f32.mrf.mxu3  ;;  %v1573_v56 = vpop.f32.mrf.mxu0 }
 0x1e1   : > { %v1217_v63 = vpop.f32.mrf.mxu1  ;;  %v1574_v60 = vadd.f32 %v1573_v56, %v1519_v10 }
 0x1e2   : > { %v1218_v39 = vadd.f32 %v1217_v63, %v2984_v34  ;;  %v1522_v34 = vadd.f32 %v1521_v24, %v1466_v29 }
 0x1e3   : > { %v1636_v25 = vadd.f32 %v1620_v19, %v1574_v60 }
 0x1e4   : > { %v1622_v61 = vadd.f32 %v1606_v32, %v1218_v39 }
 0x1e5   : > { %v2270_v33 = vpack.c.bf16 %v1636_v25, %v1635_v50 }
 0x1e7   : > { %2290 = vst [vmem:[%s3042_s22 + $0x20] sm:$0xff] %v2270_v33   ;;  %v1468_v11 = vpop.f32.mrf.mxu2 }
 0x1e8   : > { %v1523_v45 = vpop.f32.mrf.mxu3  ;;  %v1576_v44 = vpop.f32.mrf.mxu0 }
 0x1e9   : > { %v1220_v52 = vpop.f32.mrf.mxu1  ;;  %v1524_v26 = vadd.f32 %v1523_v45, %v1468_v11  ;;  %v1577_v1 = vadd.f32 %v1576_v44, %v1522_v34 }
 0x1ea   : > { %v1221_v35 = vadd.f32 %v1220_v52, %v2989_v8 }
 0x1eb   : > { %v1637_v17 = vadd.f32 %v1621_v57, %v1577_v1 }
 0x1ec   : > { %v1623_v21 = vadd.f32 %v1607_v16, %v1221_v35 }
 0x1ef   : > { %v1471_v22 = vpop.f32.mrf.mxu2 }
 0x1f0   : > { %v1526_v62 = vpop.f32.mrf.mxu3  ;;  %v1578_v37 = vpop.f32.mrf.mxu0 }
 0x1f1   : > { %v1222_v4 = vpop.f32.mrf.mxu1  ;;  %v1579_v40 = vadd.f32 %v1578_v37, %v1524_v26 }
 0x1f2   : > { %v1223_v18 = vadd.f32 %v1222_v4, %v2998_v31  ;;  %v1527_v31 = vadd.f32 %v1526_v62, %v1471_v22 }
 0x1f3   : > { %v1638_v6 = vadd.f32 %v1622_v61, %v1579_v40 }
 0x1f4   : > { %v1624_v8 = vadd.f32 %v1608_v27, %v1223_v18 }
 0x1f5   : > { %v2275_v13 = vpack.c.bf16 %v1638_v6, %v1637_v17 }
 0x1f7   : > { %2291 = vst [vmem:[%s3042_s22 + $0x28] sm:$0xff] %v2275_v13   ;;  %v1473_v38 = vpop.f32.mrf.mxu2 }
 0x1f8   : > { %v1528_v53 = vpop.f32.mrf.mxu3  ;;  %v1581_v23 = vpop.f32.mrf.mxu0 }
 0x1f9   : > { %v1225_v41 = vpop.f32.mrf.mxu1  ;;  %v1529_v5 = vadd.f32 %v1528_v53, %v1473_v38  ;;  %v1582_v42 = vadd.f32 %v1581_v23, %v1527_v31 }
 0x1fa   : > { %v1226_v2 = vadd.f32 %v1225_v41, %v3002_v51 }
 0x1fb   : > { %v1639_v7 = vadd.f32 %v1623_v21, %v1582_v42 }
 0x1fc   : > { %v1625_v9 = vadd.f32 %v1609_v59, %v1226_v2 }
 0x1ff   : > { %v1476_v43 = vpop.f32.mrf.mxu2 }
 0x200   : > { %v1583_v55 = vpop.f32.mrf.mxu0  ;;  %v1531_v30 = vpop.f32.mrf.mxu3 }
 0x201   : > { %v1227_v0 = vpop.f32.mrf.mxu1  ;;  %v1584_v19 = vadd.f32 %v1583_v55, %v1529_v5  ;;  %v1532_v36 = vadd.f32 %v1531_v30, %v1476_v43 }
 0x202   : > { %v1228_v58 = vadd.f32 %v1227_v0, %v3008_v12 }
 0x203   : > { %v1640_v46 = vadd.f32 %v1624_v8, %v1584_v19 }
 0x204   : > { %v1626_v51 = vadd.f32 %v1610_v49, %v1228_v58 }
 0x205   : > { %v2280_v20 = vpack.c.bf16 %v1640_v46, %v1639_v7 }
 0x207   : > { %2292 = vst [vmem:[%s3042_s22 + $0x30] sm:$0xff] %v2280_v20   ;;  %v1478_v14 = vpop.f32.mrf.mxu2 }
 0x208   : > { %v1586_v28 = vpop.f32.mrf.mxu0  ;;  %v1533_v47 = vpop.f32.mrf.mxu3 }
 0x209   : > { %v1230_v48 = vpop.f32.mrf.mxu1  ;;  %v1534_v57 = vadd.f32 %v1533_v47, %v1478_v14  ;;  %v1587_v10 = vadd.f32 %v1586_v28, %v1532_v36 }
 0x20b   : > { %v1641_v15 = vadd.f32 %v1625_v9, %v1587_v10 }
 0x210   : > { %v1588_v3 = vpop.f32.mrf.mxu0 }
 0x211   : > { %v1231_v12 = vpop.f32.mrf.mxu1  ;;  %v1589_v29 = vadd.f32 %v1588_v3, %v1534_v57 }
 0x213   : > { %v1642_v54 = vadd.f32 %v1626_v51, %v1589_v29 }
 0x215   : > { %v2285_v24 = vpack.c.bf16 %v1642_v54, %v1641_v15 }
 0x217   : > { %2293 = vst [vmem:[%s3042_s22 + $0x38] sm:$0xff] %v2285_v24  }
 0x218 PF: > { %s13_s12 = sadd.s32 1, %s2337_s12  }
 0x219   : > { %p10_p5 = scmp.ge.s32.totalorder %s13_s12, 4  }
 0x21b   :  { %12 = sbr.rel (!%p10_p5) target bundleno = 1 (0x1), region = 64 }

</bundles_post_ra>
